<compile_context>
chip_gen: v7x
topology: tpu7x:2x2x1
jax: 0.10.0
libtpu: 0.0.40
codegen_flags: <defaults>
</compile_context>

<pallas_src>
import math
from functools import partial

import numpy as np
import jax
import jax.numpy as jnp
from jax.experimental import pallas as pl
from jax.experimental.pallas import tpu as pltpu


def _round_up(n, m):
    return ((n + m - 1) // m) * m


# ----------------------------- Pallas kernel ------------------------------- #
def _sigmoid(x):
    # Exact identity sigmoid(x) = 0.5*(tanh(x/2)+1): one EUP transcendental.
    return 0.5 * (jnp.tanh(0.5 * x) + 1.0)


def attention_head_kernel(x_ref, w_ref, p_ref, o_ref, *, C, P, NCP, W1, offw, offp):
    x = x_ref[...]                                               # (TB, C, P) f32
    TB = x.shape[0]
    bf16, f32 = jnp.bfloat16, jnp.float32

    # ---- bf16 MXU-weight slab (16-row-aligned, lane-offset-0 blocks) ----
    caw1 = w_ref[offw["caw1"]:offw["caw1"] + C, 0:W1]            # (C, W1)
    caw2 = w_ref[offw["caw2"]:offw["caw2"] + W1, 0:C]            # (W1, C)
    toep = w_ref[offw["toep"]:offw["toep"] + 2 * P, 0:P]         # (2P, P)
    whd  = w_ref[offw["w_head"]:offw["w_head"] + C, 0:NCP]       # (C, NCP)

    # ---- f32 elementwise-parameter slab ----
    bns = p_ref[offp["bns"]:offp["bns"] + C, 0:1]                # (C, 1)
    bnb = p_ref[offp["bnb"]:offp["bnb"] + C, 0:1]                # (C, 1)
    dww = p_ref[offp["dww"]:offp["dww"] + C, 0:P]                # (C, P)
    bhd = p_ref[offp["b_head"]:offp["b_head"] + 1, 0:NCP]        # (1, NCP)

    # ---------------- ChannelAttention (avg & max fused on sublanes) --------
    avg_c = jnp.mean(x, axis=2)                                  # (TB, C)
    max_c = jnp.max(x, axis=2)                                   # (TB, C)
    both = jnp.concatenate([avg_c, max_c], axis=0).astype(bf16)  # (2TB, C)
    h = jnp.maximum(jnp.dot(both, caw1, preferred_element_type=f32), 0.0)
    mo = jnp.dot(h.astype(bf16), caw2, preferred_element_type=f32)   # (2TB, C)
    ca = _sigmoid(mo[:TB] + mo[TB:])                             # (TB, C) f32

    # outer BatchNorm2d scale folded into the channel gate, then bias + ReLU
    gate = ca[:, :, None] * bns[None, :, :]                      # (TB, C, 1)
    c_out = jnp.maximum(x * gate + bnb[None, :, :], 0.0)         # (TB, C, P)

    # ---------------- SpatialAttention (single fused Toeplitz matmul) -------
    avg_s = jnp.mean(c_out, axis=1)                              # (TB, P)
    max_s = jnp.max(c_out, axis=1)                               # (TB, P)
    cat = jnp.concatenate([avg_s, max_s], axis=1).astype(bf16)   # (TB, 2P)
    sa = _sigmoid(jnp.dot(cat, toep, preferred_element_type=f32))  # (TB, P)

    # residual=False -> no skip; second outer-BN application + ReLU
    s_out = jnp.maximum(c_out * sa[:, None, :] * bns[None, :, :] + bnb[None, :, :],
                        0.0)                                     # (TB, C, P)

    # ---------------- Head (depthwise reduce + fully folded linear tail) ----
    dw = jnp.sum(s_out * dww[None, :, :], axis=2)                # (TB, C)
    logits = jnp.dot(dw.astype(bf16), whd, preferred_element_type=f32) + bhd
    o_ref[...] = logits.astype(o_ref.dtype)                      # (TB, NCP)


# ------------------------------- glue / setup ------------------------------ #
def bn_scale_bias(gamma, beta, mean, var, eps=1e-5):
    gamma, beta, mean, var = (np.asarray(a, np.float32) for a in (gamma, beta, mean, var))
    s = gamma / np.sqrt(var + eps)
    return s, beta - mean * s


def spatial_conv_toeplitz(w, H, W):
    """(1, 2, 3, 3) SpatialAttention conv weight -> (2, P, P) matrices such
    that out_flat = avg_flat @ M[0] + max_flat @ M[1] (3x3, stride 1, pad 1)."""
    P = H * W
    w = np.asarray(w, dtype=np.float32)
    M = np.zeros((2, P, P), dtype=np.float32)
    for c in range(2):
        for dy in range(3):
            for dx in range(3):
                oy, ox = dy - 1, dx - 1
                for y in range(H):
                    for x in range(W):
                        yy, xx = y + oy, x + ox
                        if 0 <= yy < H and 0 <= xx < W:
                            M[c, yy * W + xx, y * W + x] += w[0, c, dy, dx]
    return M


def _pack_slab(sections, width, dtype, align):
    """Pack 2-D parameter blocks into one (R, width) slab of `dtype`.
    Every block starts at an `align`-aligned row and at lane 0."""
    offsets, row = {}, 0
    for name, arr in sections:
        offsets[name] = row
        row = _round_up(row + arr.shape[0], align)
    total = max(_round_up(row, align), align)
    slab = np.zeros((total, width), np.float32)
    for name, arr in sections:
        a = np.asarray(arr, np.float32)
        slab[offsets[name]:offsets[name] + a.shape[0], :a.shape[1]] = a
    return jnp.asarray(slab, dtype), offsets


def attention_head(x, p, batch_tile=None):
    B, C, H, W = x.shape
    P = H * W
    NC = p["out_w"].shape[0]
    Cr = p["ca_w1"].shape[0]
    NCP = _round_up(max(NC, 128), 128)           # lane-dense logits
    width = _round_up(max(NCP, C, P), 128)       # slab lane width
    W1 = min(width, _round_up(max(Cr, 8), 128))  # fc1 output lanes (zero-padded)

    if batch_tile is None:
        # Two evenly sized "parallel" grid steps: balances both v7x TCs and is
        # within one ~0.35us step of a single fat step on v5e/v6e.
        TB = B // 2 if (B % 2 == 0 and B >= 2) else B
    else:
        TB = batch_tile
    assert B % TB == 0, "batch must be divisible by the batch tile"

    x_flat = x.reshape(B, C, P).astype(jnp.float32)

    # ChannelAttention 1x1-conv weights as matmul operands: fc1 padded to the
    # full 128-lane width, fc2 rows padded to match (zero K/N is free on MXU).
    caw1 = np.zeros((C, W1), np.float32)
    caw1[:, :Cr] = np.asarray(p["ca_w1"], np.float32).reshape(Cr, C).T
    caw2 = np.zeros((W1, C), np.float32)
    caw2[:Cr, :] = np.asarray(p["ca_w2"], np.float32).reshape(C, Cr).T

    # 3x3 spatial conv as ONE (2P, P) Toeplitz slab (avg rows on top, max below)
    Mt = spatial_conv_toeplitz(p["sa_w"], H, W)
    toep = np.concatenate([Mt[0], Mt[1]], axis=0)                # (2P, P)

    # outer BatchNorm2d (applied twice in the module)
    bns, bnb = bn_scale_bias(p["bn_g"], p["bn_b"], p["bn_m"], p["bn_v"])

    # ---- fold the whole Head linear tail into one (C, NC) matmul + bias ----
    hbns, hbnb = bn_scale_bias(p["hbn_g"], p["hbn_b"], p["hbn_m"], p["hbn_v"])
    bn1s, bn1b = bn_scale_bias(p["bn1_g"], p["bn1_b"], p["bn1_m"], p["bn1_v"])
    linT = np.asarray(p["lin_w"], np.float32).T                  # (C, E)
    outT = np.asarray(p["out_w"], np.float32).T                  # (E, NC)
    m_tail = (linT * bn1s[None, :]) @ outT                       # (C, NC)
    b_head = (hbnb @ m_tail + bn1b @ outT
              + np.asarray(p["out_b"], np.float32)).reshape(1, NC)
    dww = np.asarray(p["dw_w"], np.float32).reshape(C, P) * hbns[:, None]
    # TODO(synk): Dropout(p=0.5) is identity here (eval-mode forward only).

    # bf16 slab: MXU weight operands.  f32 slab: BN / bias / depthwise params.
    wslab, offw = _pack_slab(
        [("caw1", caw1), ("caw2", caw2), ("toep", toep), ("w_head", m_tail)],
        width=width, dtype=jnp.bfloat16, align=16)
    pslab, offp = _pack_slab(
        [("bns", bns.reshape(C, 1)), ("bnb", bnb.reshape(C, 1)),
         ("dww", dww), ("b_head", b_head)],
        width=width, dtype=jnp.float32, align=8)

    kernel = partial(attention_head_kernel, C=C, P=P, NCP=NCP, W1=W1,
                     offw=offw, offp=offp)

    out = pl.pallas_call(
        kernel,
        out_shape=jax.ShapeDtypeStruct((B, NCP), jnp.float32),
        grid=(B // TB,),
        in_specs=[
            pl.BlockSpec((TB, C, P), lambda b: (b, 0, 0)),       # batch tile of x
            pl.BlockSpec(wslab.shape, lambda b: (0, 0)),         # bf16 weight slab
            pl.BlockSpec(pslab.shape, lambda b: (0, 0)),         # f32 param slab
        ],
        out_specs=pl.BlockSpec((TB, NCP), lambda b: (b, 0)),
        compiler_params=pltpu.CompilerParams(
            dimension_semantics=("parallel",)),
    )(x_flat, wslab, pslab)
    return out[:, :NC]


# --------------------------- pure-JAX reference ---------------------------- #
def reference(x, p):
    B, C, H, W = x.shape
    avg = x.mean(axis=(2, 3))
    mx = x.max(axis=(2, 3))
    w1 = p["ca_w1"].reshape(-1, C)
    w2 = p["ca_w2"].reshape(C, -1)

    def mlp(v):
        return jnp.maximum(v @ w1.T, 0.0) @ w2.T

    ca = jax.nn.sigmoid(mlp(avg) + mlp(mx))
    c_out = x * ca[:, :, None, None]

    s, b = bn_scale_bias(p["bn_g"], p["bn_b"], p["bn_m"], p["bn_v"])
    c_out = jnp.maximum(c_out * s[None, :, None, None] + b[None, :, None, None], 0.0)

    avg_s = c_out.mean(axis=1, keepdims=True)
    max_s = c_out.max(axis=1, keepdims=True)
    cat = jnp.concatenate([avg_s, max_s], axis=1)
    conv = jax.lax.conv_general_dilated(
        cat, p["sa_w"], (1, 1), "SAME",
        dimension_numbers=("NCHW", "OIHW", "NCHW"))
    sa = jax.nn.sigmoid(conv)
    s_out = c_out * sa
    s_out = jnp.maximum(s_out * s[None, :, None, None] + b[None, :, None, None], 0.0)

    dw = jnp.sum(s_out * p["dw_w"].reshape(1, C, H, W), axis=(2, 3))
    hs, hb = bn_scale_bias(p["hbn_g"], p["hbn_b"], p["hbn_m"], p["hbn_v"])
    dw = dw * hs[None, :] + hb[None, :]
    emb = dw @ p["lin_w"].T
    s1, b1 = bn_scale_bias(p["bn1_g"], p["bn1_b"], p["bn1_m"], p["bn1_v"])
    emb = emb * s1[None, :] + b1[None, :]
    return emb @ p["out_w"].T + p["out_b"][None, :]


def init_params(key, C, ratio, E, NC):
    Cr = C // ratio
    ks = jax.random.split(key, 20)
    f32 = jnp.float32
    p = {}
    p["ca_w1"] = 0.2 * jax.random.normal(ks[0], (Cr, C, 1, 1), f32)
    p["ca_w2"] = 0.2 * jax.random.normal(ks[1], (C, Cr, 1, 1), f32)
    p["sa_w"] = 0.3 * jax.random.normal(ks[2], (1, 2, 3, 3), f32)
    p["bn_g"] = 1.0 + 0.1 * jax.random.normal(ks[3], (C,), f32)
    p["bn_b"] = 0.1 * jax.random.normal(ks[4], (C,), f32)
    p["bn_m"] = 0.1 * jax.random.normal(ks[5], (C,), f32)
    p["bn_v"] = jnp.abs(1.0 + 0.1 * jax.random.normal(ks[6], (C,), f32))
    p["dw_w"] = 0.1 * jax.random.normal(ks[7], (C, 1, 7, 7), f32)
    p["hbn_g"] = 1.0 + 0.1 * jax.random.normal(ks[8], (C,), f32)
    p["hbn_b"] = 0.1 * jax.random.normal(ks[9], (C,), f32)
    p["hbn_m"] = 0.1 * jax.random.normal(ks[10], (C,), f32)
    p["hbn_v"] = jnp.abs(1.0 + 0.1 * jax.random.normal(ks[11], (C,), f32))
    p["lin_w"] = (1.0 / math.sqrt(C)) * jax.random.normal(ks[12], (E, C), f32)
    p["bn1_g"] = 1.0 + 0.1 * jax.random.normal(ks[13], (E,), f32)
    p["bn1_b"] = 0.1 * jax.random.normal(ks[14], (E,), f32)
    p["bn1_m"] = 0.1 * jax.random.normal(ks[15], (E,), f32)
    p["bn1_v"] = jnp.abs(1.0 + 0.1 * jax.random.normal(ks[16], (E,), f32))
    p["out_w"] = (1.0 / math.sqrt(E)) * jax.random.normal(ks[17], (NC, E), f32)
    p["out_b"] = 0.1 * jax.random.normal(ks[18], (NC,), f32)
    return p


if __name__ == "__main__":
    # Head's depthwise 7x7 conv (padding 0) requires a 7x7 spatial input.
    # B=16 with the default batch tile (B/2) -> a 2-step "parallel" grid.
    B, C, H, W = 16, 32, 7, 7
    E, NC = 64, 16          # embedding_size, classes (small, deterministic)

    key = jax.random.PRNGKey(0)
    kx, kp = jax.random.split(key)
    x = jax.random.normal(kx, (B, C, H, W), jnp.float32)
    params = init_params(kp, C, ratio=16, E=E, NC=NC)

    out = attention_head(x, params)
    out = jax.block_until_ready(out)

    ref = reference(x, params)
    assert out.shape == (B, NC)
    assert bool(jnp.all(jnp.isfinite(out)))
    max_err = float(jnp.max(jnp.abs(out - ref)))
    assert bool(jnp.allclose(out, ref, rtol=5e-2, atol=5e-2)), max_err
    print("KERNEL_OK")
</pallas_src>

<mosaic_0001>
module attributes {stable_mosaic.version = 11 : i64} {
  func.func @attention_head_kernel(%arg0: i32, %arg1: memref<8x32x49xf32, #tpu.memory_space<vmem>>, %arg2: memref<304x128xbf16, #tpu.memory_space<vmem>>, %arg3: memref<104x128xf32, #tpu.memory_space<vmem>>, %arg4: memref<8x128xf32, #tpu.memory_space<vmem>>) attributes {dimension_semantics = [#tpu.dimension_semantics<parallel>], iteration_bounds = array<i64: 2>, scalar_prefetch = 0 : i64, scratch_operands = 0 : i64, tpu.core_type = #tpu.core_type<tc>, window_params = [{transform_indices = @transform_0, window_bounds = array<i64: 8, 32, 49>}, {pipeline_mode = #tpu.pipeline_mode<synchronous>, transform_indices = @transform_1, window_bounds = array<i64: 304, 128>}, {pipeline_mode = #tpu.pipeline_mode<synchronous>, transform_indices = @transform_2, window_bounds = array<i64: 104, 128>}, {transform_indices = @transform_3, window_bounds = array<i64: 8, 128>}]} {
    %c0 = arith.constant 0 : index
    %c0_0 = arith.constant 0 : index
    %c0_1 = arith.constant 0 : index
    %0 = vector.load %arg1[%c0, %c0_0, %c0_1] : memref<8x32x49xf32, #tpu.memory_space<vmem>>, vector<8x32x49xf32>
    %c0_2 = arith.constant 0 : index
    %c0_3 = arith.constant 0 : index
    %1 = vector.load %arg2[%c0_2, %c0_3] : memref<304x128xbf16, #tpu.memory_space<vmem>>, vector<32x128xbf16>
    %c32 = arith.constant 32 : index
    %c0_4 = arith.constant 0 : index
    %2 = vector.load %arg2[%c32, %c0_4] : memref<304x128xbf16, #tpu.memory_space<vmem>>, vector<128x32xbf16>
    %c160 = arith.constant 160 : index
    %c0_5 = arith.constant 0 : index
    %3 = vector.load %arg2[%c160, %c0_5] : memref<304x128xbf16, #tpu.memory_space<vmem>>, vector<98x49xbf16>
    %c272 = arith.constant 272 : index
    %c0_6 = arith.constant 0 : index
    %4 = vector.load %arg2[%c272, %c0_6] : memref<304x128xbf16, #tpu.memory_space<vmem>>, vector<32x128xbf16>
    %c0_7 = arith.constant 0 : index
    %c0_8 = arith.constant 0 : index
    %5 = vector.load %arg3[%c0_7, %c0_8] : memref<104x128xf32, #tpu.memory_space<vmem>>, vector<32x1xf32>
    %c32_9 = arith.constant 32 : index
    %c0_10 = arith.constant 0 : index
    %6 = vector.load %arg3[%c32_9, %c0_10] : memref<104x128xf32, #tpu.memory_space<vmem>>, vector<32x1xf32>
    %c64 = arith.constant 64 : index
    %c0_11 = arith.constant 0 : index
    %7 = vector.load %arg3[%c64, %c0_11] : memref<104x128xf32, #tpu.memory_space<vmem>>, vector<32x49xf32>
    %c96 = arith.constant 96 : index
    %c0_12 = arith.constant 0 : index
    %8 = vector.load %arg3[%c96, %c0_12] : memref<104x128xf32, #tpu.memory_space<vmem>>, vector<1x128xf32>
    %cst = arith.constant dense<0.000000e+00> : vector<8x32xf32>
    %9 = vector.multi_reduction <add>, %0, %cst [2] : vector<8x32x49xf32> to vector<8x32xf32>
    %cst_13 = arith.constant 4.900000e+01 : f32
    %10 = vector.broadcast %cst_13 : f32 to vector<8x32xf32>
    %11 = arith.divf %9, %10 : vector<8x32xf32>
    %cst_14 = arith.constant dense<0xFF800000> : vector<8x32xf32>
    %12 = vector.multi_reduction <maximumf>, %0, %cst_14 [2] : vector<8x32x49xf32> to vector<8x32xf32>
    %13 = tpu.concatenate %11, %12 in 0 : vector<8x32xf32>, vector<8x32xf32> -> vector<16x32xf32>
    %14 = arith.truncf %13 : vector<16x32xf32> to vector<16x32xbf16>
    %cst_15 = arith.constant dense<0.000000e+00> : vector<16x128xf32>
    %15 = tpu.matmul %14, %1, %cst_15 {dimension_numbers = #tpu.dot_dimension_numbers<[1], [0], [0], [1], [0, 0, 1, 1], [], []>} : vector<16x32xbf16>, vector<32x128xbf16>, vector<16x128xf32> -> vector<16x128xf32>
    %cst_16 = arith.constant 0.000000e+00 : f32
    %16 = vector.broadcast %cst_16 : f32 to vector<16x128xf32>
    %17 = arith.maximumf %15, %16 : vector<16x128xf32>
    %18 = arith.truncf %17 : vector<16x128xf32> to vector<16x128xbf16>
    %cst_17 = arith.constant dense<0.000000e+00> : vector<16x32xf32>
    %19 = tpu.matmul %18, %2, %cst_17 {dimension_numbers = #tpu.dot_dimension_numbers<[1], [0], [0], [1], [0, 0, 1, 1], [], []>} : vector<16x128xbf16>, vector<128x32xbf16>, vector<16x32xf32> -> vector<16x32xf32>
    %20 = vector.extract_strided_slice %19 {offsets = [0, 0], sizes = [8, 32], strides = [1, 1]} : vector<16x32xf32> to vector<8x32xf32>
    %21 = vector.extract_strided_slice %19 {offsets = [8, 0], sizes = [8, 32], strides = [1, 1]} : vector<16x32xf32> to vector<8x32xf32>
    %22 = arith.addf %20, %21 : vector<8x32xf32>
    %cst_18 = arith.constant 5.000000e-01 : f32
    %23 = vector.broadcast %cst_18 : f32 to vector<8x32xf32>
    %24 = arith.mulf %23, %22 : vector<8x32xf32>
    %25 = math.tanh %24 : vector<8x32xf32>
    %cst_19 = arith.constant 1.000000e+00 : f32
    %26 = vector.broadcast %cst_19 : f32 to vector<8x32xf32>
    %27 = arith.addf %25, %26 : vector<8x32xf32>
    %cst_20 = arith.constant 5.000000e-01 : f32
    %28 = vector.broadcast %cst_20 : f32 to vector<8x32xf32>
    %29 = arith.mulf %28, %27 : vector<8x32xf32>
    %30 = vector.shape_cast %29 : vector<8x32xf32> to vector<8x32x1xf32>
    %31 = vector.shape_cast %5 : vector<32x1xf32> to vector<1x32x1xf32>
    %32 = vector.broadcast %31 : vector<1x32x1xf32> to vector<8x32x1xf32>
    %33 = arith.mulf %30, %32 : vector<8x32x1xf32>
    %34 = vector.broadcast %33 : vector<8x32x1xf32> to vector<8x32x49xf32>
    %35 = arith.mulf %0, %34 : vector<8x32x49xf32>
    %36 = vector.shape_cast %6 : vector<32x1xf32> to vector<1x32x1xf32>
    %37 = vector.broadcast %36 : vector<1x32x1xf32> to vector<8x32x49xf32>
    %38 = arith.addf %35, %37 : vector<8x32x49xf32>
    %cst_21 = arith.constant 0.000000e+00 : f32
    %39 = vector.broadcast %cst_21 : f32 to vector<8x32x49xf32>
    %40 = arith.maximumf %38, %39 : vector<8x32x49xf32>
    %cst_22 = arith.constant dense<0.000000e+00> : vector<8x49xf32>
    %41 = vector.multi_reduction <add>, %40, %cst_22 [1] : vector<8x32x49xf32> to vector<8x49xf32>
    %cst_23 = arith.constant 3.200000e+01 : f32
    %42 = vector.broadcast %cst_23 : f32 to vector<8x49xf32>
    %43 = arith.divf %41, %42 : vector<8x49xf32>
    %cst_24 = arith.constant dense<0xFF800000> : vector<8x49xf32>
    %44 = vector.multi_reduction <maximumf>, %40, %cst_24 [1] : vector<8x32x49xf32> to vector<8x49xf32>
    %45 = tpu.concatenate %43, %44 in 1 : vector<8x49xf32>, vector<8x49xf32> -> vector<8x98xf32>
    %46 = arith.truncf %45 : vector<8x98xf32> to vector<8x98xbf16>
    %cst_25 = arith.constant dense<0.000000e+00> : vector<8x49xf32>
    %47 = tpu.matmul %46, %3, %cst_25 {dimension_numbers = #tpu.dot_dimension_numbers<[1], [0], [0], [1], [0, 0, 1, 1], [], []>} : vector<8x98xbf16>, vector<98x49xbf16>, vector<8x49xf32> -> vector<8x49xf32>
    %cst_26 = arith.constant 5.000000e-01 : f32
    %48 = vector.broadcast %cst_26 : f32 to vector<8x49xf32>
    %49 = arith.mulf %48, %47 : vector<8x49xf32>
    %50 = math.tanh %49 : vector<8x49xf32>
    %cst_27 = arith.constant 1.000000e+00 : f32
    %51 = vector.broadcast %cst_27 : f32 to vector<8x49xf32>
    %52 = arith.addf %50, %51 : vector<8x49xf32>
    %cst_28 = arith.constant 5.000000e-01 : f32
    %53 = vector.broadcast %cst_28 : f32 to vector<8x49xf32>
    %54 = arith.mulf %53, %52 : vector<8x49xf32>
    %55 = vector.shape_cast %54 : vector<8x49xf32> to vector<8x1x49xf32>
    %56 = vector.broadcast %55 : vector<8x1x49xf32> to vector<8x32x49xf32>
    %57 = arith.mulf %40, %56 : vector<8x32x49xf32>
    %58 = vector.shape_cast %5 : vector<32x1xf32> to vector<1x32x1xf32>
    %59 = vector.broadcast %58 : vector<1x32x1xf32> to vector<8x32x49xf32>
    %60 = arith.mulf %57, %59 : vector<8x32x49xf32>
    %61 = vector.shape_cast %6 : vector<32x1xf32> to vector<1x32x1xf32>
    %62 = vector.broadcast %61 : vector<1x32x1xf32> to vector<8x32x49xf32>
    %63 = arith.addf %60, %62 : vector<8x32x49xf32>
    %cst_29 = arith.constant 0.000000e+00 : f32
    %64 = vector.broadcast %cst_29 : f32 to vector<8x32x49xf32>
    %65 = arith.maximumf %63, %64 : vector<8x32x49xf32>
    %66 = vector.shape_cast %7 : vector<32x49xf32> to vector<1x32x49xf32>
    %67 = vector.broadcast %66 : vector<1x32x49xf32> to vector<8x32x49xf32>
    %68 = arith.mulf %65, %67 : vector<8x32x49xf32>
    %cst_30 = arith.constant dense<0.000000e+00> : vector<8x32xf32>
    %69 = vector.multi_reduction <add>, %68, %cst_30 [2] : vector<8x32x49xf32> to vector<8x32xf32>
    %70 = arith.truncf %69 : vector<8x32xf32> to vector<8x32xbf16>
    %cst_31 = arith.constant dense<0.000000e+00> : vector<8x128xf32>
    %71 = tpu.matmul %70, %4, %cst_31 {dimension_numbers = #tpu.dot_dimension_numbers<[1], [0], [0], [1], [0, 0, 1, 1], [], []>} : vector<8x32xbf16>, vector<32x128xbf16>, vector<8x128xf32> -> vector<8x128xf32>
    %72 = vector.broadcast %8 : vector<1x128xf32> to vector<8x128xf32>
    %73 = arith.addf %71, %72 : vector<8x128xf32>
    %c0_32 = arith.constant 0 : index
    %c0_33 = arith.constant 0 : index
    %74 = vector.load %arg4[%c0_32, %c0_33] : memref<8x128xf32, #tpu.memory_space<vmem>>, vector<8x128xf32>
    tpu.vector_store %arg4[%c0_32, %c0_33], %73 {strides = array<i32>} : memref<8x128xf32, #tpu.memory_space<vmem>>, vector<8x128xf32>,
    return
  }
  func.func @transform_0(%arg0: i32) -> (i32, i32, i32) {
    %c0_i32 = arith.constant 0 : i32
    %c0_i32_0 = arith.constant 0 : i32
    %c0_i32_1 = arith.constant 0 : i32
    return %arg0, %c0_i32, %c0_i32_0 : i32, i32, i32
  }
  func.func @transform_1(%arg0: i32) -> (i32, i32) {
    %c0_i32 = arith.constant 0 : i32
    %c0_i32_0 = arith.constant 0 : i32
    %c0_i32_1 = arith.constant 0 : i32
    return %c0_i32, %c0_i32_0 : i32, i32
  }
  func.func @transform_2(%arg0: i32) -> (i32, i32) {
    %c0_i32 = arith.constant 0 : i32
    %c0_i32_0 = arith.constant 0 : i32
    %c0_i32_1 = arith.constant 0 : i32
    return %c0_i32, %c0_i32_0 : i32, i32
  }
  func.func @transform_3(%arg0: i32) -> (i32, i32) {
    %c0_i32 = arith.constant 0 : i32
    %c0_i32_0 = arith.constant 0 : i32
    return %arg0, %c0_i32 : i32, i32
  }
}

</mosaic_0001>

<bundles_post_ra>
// kernel: tpu_custom_call.1
= control target key start
LH: loop header
LB: loop body
LE: loop exit
PB: predicated region body
PF: predicated region fallthrough
CT: control target
= control target key end

     0   :  { %8 = vsyncpa [#allocation3], 0  ;;  %s4424_s0 = inlined_call_operand.hbm [shape: f32[16,32,49], index: 0, kind: input, shape index: {}]   ;;  %s4425_s1 = inlined_call_operand.hbm [shape: bf16[304,128], index: 1, kind: input, shape index: {}]   ;;  %s4426_s2 = inlined_call_operand.hbm [shape: f32[104,128], index: 2, kind: input, shape index: {}]   ;;  %s4427_s3 = inlined_call_operand.hbm [shape: f32[16,128], index: 3, kind: output, shape index: {}]  }
   0x1   :  { %10 = vsyncpa [#allocation3 + $0x1], 0 }
   0x2   :  { %11 = vsyncpa [#allocation6], 0 }
   0x3   :  { %12 = vsyncpa [#allocation4], 0 }
   0x4   :  { %14 = vsyncpa [#allocation4 + $0x1], 0  ;;  %s3084_s12 = smov 0   ;;  %s3086_s13 = smov 0  }
   0x5   :  { %s3088_s14 = smov 0   ;;  %s3090_s15 = smov 0  }
   0x6 LB: > { %s3105_s16 = sadd.s32 4294967295, %s3049_s15   ;;  %s2640_s17 = sadd.s32 4294967294, %s3049_s15   ;;  %s3049_s15 = sphi %s3090_s15, %s4500_s15   ;;  %s3045_s14 = sphi %s3088_s14, %s4499_s14   ;;  %s3041_s13 = sphi %s3086_s13, %s4498_s13   ;;  %s3037_s12 = sphi %s3084_s12, %s4497_s12  }
   0x7   : > { %p40_p0 = scmp.ne.s32.totalorder %s3041_s13, %s3037_s12  ;;  %p4428_p1 = scmp.eq.s32.totalorder %s3105_s16, 0 }
   0x8   : > { %p112_p3 = scmp.eq.s32.totalorder %s2640_s17, 1  ;;  %p2641_p5 = scmp.ge.s32.totalorder %s3049_s15, 1 }
   0x9   : > { %p3114_p4 = por %p4428_p1, %p40_p0  ;;  %p119_p7 = scmp.lt.s32.totalorder %s3049_s15, 3 }
   0xa   : > { %p3119_p6 = por %p112_p3, %p40_p0  ;;  %s3051_s21 = smov [#allocation5]  }
   0xb   : > { %s4456_s18 = scalar_select %p3114_p4, 1, 0 }
   0xc   : > { %s4457_s19 = scalar_select %p3119_p6, 1, 0 }
   0xd   : > { %p3124_p8 = pnand %p2641_p5, %p119_p7  ;;  %s131_s22 = sshll.u32 %s3051_s21, 4  ;;  %s3128_s22 = int_to_ptr.vmem [resolvable:$true] %s131_s22 }
   0xe   : > { %s3052_s24 = smov [#allocation7]   ;;  %s2893_s28 = scalar_lea.hbm %s4425_s1, 2432 }
   0xf   : > { %p2772_p9 = pneg %p3124_p8  ;;  %s144_s25 = sshll.u32 %s3052_s24, 4  ;;  %s3139_s25 = int_to_ptr.vmem [resolvable:$true] %s144_s25 }
  0x10   : > { %p2894_p12 = scmp.ne.s32.totalorder %s4425_s1, %s2893_s28  ;;  %p2900_p5 = scmp.lt.u32.totalorder %s2893_s28, %s4425_s1 }
  0x11   : > { %p3135_p11 = pnand %p2772_p9, %p4428_p1 }
  0x13   : > { %p2895_p13 = pneg %p3135_p11 }
  0x15   : > { %p2896_p0 = pnand %p2895_p13, %p2894_p12 }
  0x17   : > { %p2897_p3 = pneg %p2896_p0 }
  0x19   : > { %p2902_p7 = pnand %p2900_p5, %p2897_p3 }
  0x1b   : > { %2905 = shalt.err (!%p2902_p7)
}
  0x1c   : > { %s2906_s6 = scalar_lea.vmem %s3128_s22, 2432  ;;  %p2914_p2 = scmp.lt.s32.totalorder %s3128_s22, %s3128_s22 }
  0x1d   : > { %p2907_p9 = scmp.ne.s32.totalorder %s3128_s22, %s2906_s6  ;;  %p2915_p12 = scmp.lt.s32.totalorder %s2906_s6, %s2906_s6 }
  0x1f   : > { %p2909_p10 = pnand %p2907_p9, %p2895_p13  ;;  %p2916_p0 = por %p2915_p12, %p2914_p2 }
  0x21   : > { %p2910_p1 = pneg %p2909_p10 }
  0x23   : > { %p2917_p6 = pnand %p2916_p0, %p2910_p1 }
  0x25   : > { %2920 = shalt.err (!%p2917_p6)
}
  0x26   : > { %s3053_s7 = smov 64   ;;  %s3054_s8 = smov 4  }
  0x27   : > { %2775 = dma.hbm_to_vmem [thread:$0]  (!%p3135_p11), %s4425_s1, 2432, %s3128_s22, [#allocation6], %s3053_s7, %s3053_s7, %s3054_s8  }
  0x28   : > { %s2921_s21 = scalar_lea.hbm %s4426_s2, 1664 }
  0x29   : > { %p2922_p2 = scmp.ne.s32.totalorder %s4426_s2, %s2921_s21  ;;  %p2928_p10 = scmp.lt.u32.totalorder %s2921_s21, %s4426_s2 }
  0x2b   : > { %p2924_p1 = pnand %p2922_p2, %p2895_p13 }
  0x2d   : > { %p2925_p6 = pneg %p2924_p1 }
  0x2f   : > { %p2930_p3 = pnand %p2928_p10, %p2925_p6 }
  0x31   : > { %2933 = shalt.err (!%p2930_p3)
}
  0x32   : > { %s2934_s22 = scalar_lea.vmem %s3139_s25, 1664  ;;  %p2942_p12 = scmp.lt.s32.totalorder %s3139_s25, %s3139_s25 }
  0x33   : > { %p2935_p5 = scmp.ne.s32.totalorder %s3139_s25, %s2934_s22  ;;  %p2943_p0 = scmp.lt.s32.totalorder %s2934_s22, %s2934_s22 }
  0x35   : > { %p2937_p7 = pnand %p2935_p5, %p2895_p13  ;;  %p2944_p2 = por %p2943_p0, %p2942_p12 }
  0x37   : > { %p2938_p9 = pneg %p2937_p7 }
  0x39   : > { %p2945_p1 = pnand %p2944_p2, %p2938_p9 }
  0x3b   : > { %2948 = shalt.err (!%p2945_p1)
}
  0x3c   : > { %s3055_s29 = smov 128   ;;  %s3056_s30 = smov 8  }
  0x3d   : > { %2778 = dma.hbm_to_vmem [thread:$0]  (!%p3135_p11), %s4426_s2, 1664, %s3139_s25, [#allocation6], %s3055_s29, %s3055_s29, %s3056_s30  }
  0x3e   : > { %s3197_s6 = sadd.s32 1, %s3049_s15   ;;  %s27_s8 = sadd.s32 1, %s3045_s14 }
  0x3f   : > { %s24_s7 = ssub.s32 %s3049_s15, %s3197_s6  ;;  %p34_p6 = scmp.ne.s32.totalorder %s3045_s14, %s3041_s13 }
  0x40   : > { %p25_p13 = scmp.eq.s32.totalorder %s24_s7, 0  ;;  %p35_p10 = scmp.eq.s32.totalorder %s3049_s15, 0 }
  0x41   : > { %p4460_p5 = scmp.eq.s32.totalorder %s3105_s16, 1  ;;  %p2789_p9 = scmp.lt.s32.totalorder %s3049_s15, 2 }
  0x42   : > { %s3206_s9 = scalar_select %p25_p13, %s3045_s14, %s27_s8  }
  0x43   : > { %p36_p3 = por %p35_p10, %p34_p6  ;;  %p3210_p7 = por %p4460_p5, %p34_p6 }
  0x44   : > { %s158_s10 = sand.u32 1, %s3045_s14   ;;  %s2682_s25 = sshll.u32 %s3049_s15, 12 }
  0x45   : > { %s4461_s23 = scalar_select %p3210_p7, 1, 0 }
  0x46   : > { %s2645_s11 = sshll.u32 %s158_s10, 8  ;;  %s3220_s24 = scalar_lea.hbm %s4424_s0, %s2682_s25 }
  0x47   : > { %s162_s26 = scalar_lea.vmem [#allocation2], %s2645_s11  ;;  %p3224_p11 = pnand %p2789_p9, %p36_p3 }
  0x48   : > { %s170_s27 = sshll.u32 %s162_s26, 4  ;;  %s3228_s22 = scalar_lea.sflag [#allocation3], %s158_s10  ;;  %s3222_s27 = int_to_ptr.vmem [resolvable:$true] %s170_s27 }
  0x49   : > { %s2949_s4 = scalar_lea.hbm %s3220_s24, 4096  ;;  %p2951_p0 = pneg %p3224_p11 }
  0x4a   : > { %p2950_p12 = scmp.ne.s32.totalorder %s3220_s24, %s2949_s4  ;;  %s2954_s8 = scalar_lea.hbm %s4424_s0, 8192 }
  0x4b   : > { %p2955_p13 = scmp.lt.u32.totalorder %s3220_s24, %s4424_s0  ;;  %p2956_p6 = scmp.lt.u32.totalorder %s2954_s8, %s2949_s4 }
  0x4c   : > { %p2952_p2 = pnand %p2951_p0, %p2950_p12  ;;  %p2958_p3 = scmp.lt.u32.totalorder %s2949_s4, %s3220_s24 }
  0x4d   : > { %p2957_p10 = por %p2956_p6, %p2955_p13 }
  0x4e   : > { %p2953_p1 = pneg %p2952_p2 }
  0x4f   : > { %p2959_p5 = por %p2958_p3, %p2957_p10 }
  0x51   : > { %p2960_p9 = pnand %p2959_p5, %p2953_p1 }
  0x53   : > { %2963 = shalt.err (!%p2960_p9)
}
  0x54   : > { %s2964_s10 = scalar_lea.vmem %s3222_s27, 4096  ;;  %s3057_s17 = smov [#allocation2]  }
  0x55   : > { %p2965_p12 = scmp.ne.s32.totalorder %s3222_s27, %s2964_s10  ;;  %s2969_s21 = sshll.u32 %s3057_s17, 4  ;;  %s2970_s21 = int_to_ptr.vmem [resolvable:$false] %s2969_s21 }
  0x56   : > { %s2971_s26 = scalar_lea.vmem %s2970_s21, 8192  ;;  %p2972_p4 = scmp.lt.s32.totalorder %s3222_s27, %s2970_s21 }
  0x57   : > { %p2967_p2 = pnand %p2965_p12, %p2951_p0  ;;  %p2973_p13 = scmp.lt.s32.totalorder %s2971_s26, %s2964_s10 }
  0x59   : > { %p2968_p7 = pneg %p2967_p2  ;;  %p2974_p6 = por %p2973_p13, %p2972_p4 }
  0x5b   : > { %p2975_p10 = pnand %p2974_p6, %p2968_p7 }
  0x5d   : > { %2978 = shalt.err (!%p2975_p10)
}
  0x5e   : > { %2782 = dma.hbm_to_vmem [thread:$0]  (!%p3224_p11), %s3220_s24, 4096, %s3222_s27, %s3228_s22, %s3055_s29, %s3055_s29, %s3056_s30  }
  0x5f   : > { %182 = sbr.rel (%p3124_p8) target bundleno = 1982 (0x7be), region = 32 }
  0x66   : > { %s3262_s4 = sand.u32 1, %s3041_s13   ;;  %p4463_p4 = scmp.ne.s32.totalorder %s4456_s18, 0 }
  0x67   : > { %s2650_s5 = sshll.u32 %s3262_s4, 8  ;;  %s185_s7 = scalar_lea.sflag [#allocation3], %s3262_s4 }
  0x68   : > { %s3266_s8 = scalar_lea.vmem [#allocation2], %s2650_s5 }
  0x69   : > { %3024 = dma.done.wait (%p4463_p4), %s185_s7, 4096  }
  0x6a   : > { %3026 = vsyncadd (%p4463_p4), %s185_s7, 4294963200  ;;  %p4464_p7 = scmp.eq.s32.totalorder %s3105_s16, 0 }
  0x6c   : > { %3028 = dma.done.wait (%p4464_p7), [#allocation6], 4096   ;;  %p4465_p8 = pmov %p4464_p7 }
  0x6d   : > { %vm303_vm0 = vcmask 400384   ;;  %v225_v0 = vld [vmem:[%s3266_s8 + $0x20] sm:$0xff]  ;;  %v226_v2 = vld [vmem:[%s3266_s8 + $0x28] sm:$0xff]  ;;  %v227_v8 = vld [vmem:[%s3266_s8 + $0x30] sm:$0xff]  ;;  %vm3059_vm1 = vmmov 0   ;;  %vm572_vm2 = vcmask 130112  }
  0x6e   : > { %3030 = vsyncadd (%p4465_p8), [#allocation6], 4294963200  ;;  %v221_v1 = vld [vmem:[%s3266_s8] sm:$0xff]  ;;  %v316_v3 = vsel %vm303_vm0, %v225_v0, 0.0  ;;  %v222_v5 = vld [vmem:[%s3266_s8 + $0x8] sm:$0xff]  ;;  %v319_v6 = vsel %vm303_vm0, %v226_v2, 0.0 }
  0x6f   : > { %v304_v4 = vsel %vm303_vm0, %v221_v1, 0.0  ;;  %317 = vadd.xlane.f32.xlu1 %v316_v3  ;;  %v307_v7 = vsel %vm303_vm0, %v222_v5, 0.0  ;;  %v223_v9 = vld [vmem:[%s3266_s8 + $0x10] sm:$0xff]  ;;  %v322_v10 = vsel %vm303_vm0, %v227_v8, 0.0  ;;  %v230_v12 = vld [vmem:[%s3266_s8 + $0x48] sm:$0xff]  ;;  %v229_v13 = vld [vmem:[%s3266_s8 + $0x40] sm:$0xff] }
  0x70   : > { %305 = vadd.xlane.f32.xlu0 %v304_v4  ;;  %v310_v11 = vsel %vm303_vm0, %v223_v9, 0.0  ;;  %v331_v14 = vsel %vm303_vm0, %v230_v12, 0.0  ;;  %v328_v15 = vsel %vm303_vm0, %v229_v13, 0.0  ;;  %v228_v16 = vld [vmem:[%s3266_s8 + $0x38] sm:$0xff]  ;;  %v233_v18 = vld [vmem:[%s3266_s8 + $0x60] sm:$0xff]  ;;  %v231_v21 = vld [vmem:[%s3266_s8 + $0x50] sm:$0xff] }
  0x71   : > { %v224_v17 = vld [vmem:[%s3266_s8 + $0x18] sm:$0xff]  ;;  %v325_v19 = vsel %vm303_vm0, %v228_v16, 0.0  ;;  %v340_v22 = vsel %vm303_vm0, %v233_v18, 0.0  ;;  %v334_v23 = vsel %vm303_vm0, %v231_v21, 0.0  ;;  %v234_v24 = vld [vmem:[%s3266_s8 + $0x68] sm:$0xff]  ;;  %v433_v25 = vsel %vm303_vm0, %v221_v1, -inf }
  0x72   : > { %v313_v20 = vsel %vm303_vm0, %v224_v17, 0.0  ;;  %v343_v26 = vsel %vm303_vm0, %v234_v24, 0.0  ;;  %v445_v27 = vsel %vm303_vm0, %v225_v0, -inf  ;;  %v436_v28 = vsel %vm303_vm0, %v222_v5, -inf  ;;  %v232_v29 = vld [vmem:[%s3266_s8 + $0x58] sm:$0xff]  ;;  %v237_v32 = vld [vmem:[%s3266_s8 + $0x80] sm:$0xff] }
  0x73   : > { %320 = vadd.xlane.f32.xlu1 %v319_v6  ;;  %v337_v30 = vsel %vm303_vm0, %v232_v29, 0.0  ;;  %v448_v31 = vsel %vm303_vm0, %v226_v2, -inf  ;;  %v235_v33 = vld [vmem:[%s3266_s8 + $0x70] sm:$0xff]  ;;  %v352_v34 = vsel %vm303_vm0, %v237_v32, 0.0  ;;  %v238_v36 = vld [vmem:[%s3266_s8 + $0x88] sm:$0xff]  ;;  %v439_v37 = vsel %vm303_vm0, %v223_v9, -inf }
  0x74   : > { %308 = vadd.xlane.f32.xlu0 %v307_v7  ;;  %v346_v35 = vsel %vm303_vm0, %v235_v33, 0.0  ;;  %v355_v38 = vsel %vm303_vm0, %v238_v36, 0.0  ;;  %v457_v39 = vsel %vm303_vm0, %v229_v13, -inf  ;;  %v451_v40 = vsel %vm303_vm0, %v227_v8, -inf  ;;  %v236_v41 = vld [vmem:[%s3266_s8 + $0x78] sm:$0xff]  ;;  %v241_v44 = vld [vmem:[%s3266_s8 + $0xa0] sm:$0xff] }
  0x75   : > { %v349_v42 = vsel %vm303_vm0, %v236_v41, 0.0  ;;  %v460_v43 = vsel %vm303_vm0, %v230_v12, -inf  ;;  %v239_v45 = vld [vmem:[%s3266_s8 + $0x90] sm:$0xff]  ;;  %v364_v46 = vsel %vm303_vm0, %v241_v44, 0.0  ;;  %v242_v48 = vld [vmem:[%s3266_s8 + $0xa8] sm:$0xff]  ;;  %v442_v49 = vsel %vm303_vm0, %v224_v17, -inf }
  0x76   : > { %v358_v47 = vsel %vm303_vm0, %v239_v45, 0.0  ;;  %v367_v50 = vsel %vm303_vm0, %v242_v48, 0.0  ;;  %v463_v51 = vsel %vm303_vm0, %v231_v21, -inf  ;;  %v454_v52 = vsel %vm303_vm0, %v228_v16, -inf  ;;  %v243_v55 = vld [vmem:[%s3266_s8 + $0xb0] sm:$0xff]  ;;  %v240_v56 = vld [vmem:[%s3266_s8 + $0x98] sm:$0xff] }
  0x77   : > { %323 = vadd.xlane.f32.xlu1 %v322_v10  ;;  %v472_v53 = vsel %vm303_vm0, %v234_v24, -inf  ;;  %v469_v54 = vsel %vm303_vm0, %v233_v18, -inf  ;;  %v370_v57 = vsel %vm303_vm0, %v243_v55, 0.0  ;;  %v361_v58 = vsel %vm303_vm0, %v240_v56, 0.0  ;;  %v246_v59 = vld [vmem:[%s3266_s8 + $0xc8] sm:$0xff]  ;;  %v245_v60 = vld [vmem:[%s3266_s8 + $0xc0] sm:$0xff] }
  0x78   : > { %311 = vadd.xlane.f32.xlu0 %v310_v11  ;;  %v379_v61 = vsel %vm303_vm0, %v246_v59, 0.0  ;;  %v376_v62 = vsel %vm303_vm0, %v245_v60, 0.0  ;;  %v475_v63 = vsel %vm303_vm0, %v235_v33, -inf  ;;  %v466_v0 = vsel %vm303_vm0, %v232_v29, -inf  ;;  %v247_v3 = vld [vmem:[%s3266_s8 + $0xd0] sm:$0xff]  ;;  %v244_v4 = vld [vmem:[%s3266_s8 + $0xb8] sm:$0xff] }
  0x79   : > { %v484_v1 = vsel %vm303_vm0, %v238_v36, -inf  ;;  %v481_v2 = vsel %vm303_vm0, %v237_v32, -inf  ;;  %v382_v5 = vsel %vm303_vm0, %v247_v3, 0.0  ;;  %v373_v6 = vsel %vm303_vm0, %v244_v4, 0.0  ;;  %v250_v7 = vld [vmem:[%s3266_s8 + $0xe8] sm:$0xff]  ;;  %v249_v8 = vld [vmem:[%s3266_s8 + $0xe0] sm:$0xff] }
  0x7a   : > { %v391_v9 = vsel %vm303_vm0, %v250_v7, 0.0  ;;  %v388_v10 = vsel %vm303_vm0, %v249_v8, 0.0  ;;  %v487_v11 = vsel %vm303_vm0, %v239_v45, -inf  ;;  %v478_v12 = vsel %vm303_vm0, %v236_v41, -inf  ;;  %v248_v16 = vld [vmem:[%s3266_s8 + $0xd8] sm:$0xff]  ;;  %v2838_v32 = vld [vmem:[#allocation5] sm:$0xff]  }
  0x7b   : > { %332 = vadd.xlane.f32.xlu1 %v331_v14  ;;  %v496_v13 = vsel %vm303_vm0, %v242_v48, -inf  ;;  %v493_v14 = vsel %vm303_vm0, %v241_v44, -inf  ;;  %v385_v18 = vsel %vm303_vm0, %v248_v16, 0.0  ;;  %v508_v21 = vsel %vm303_vm0, %v246_v59, -inf  ;;  %s3061_s18 = smov 49   ;;  %s2653_s20 = sshll.u32 %s3262_s4, 3 }
  0x7c   : > { %329 = vadd.xlane.f32.xlu0 %v328_v15  ;;  %v251_v15 = vld [vmem:[%s3266_s8 + $0xf0] sm:$0xff]  ;;  %v502_v24 = vsel %vm303_vm0, %v244_v4, -inf  ;;  %v520_v29 = vsel %vm303_vm0, %v250_v7, -inf  ;;  %v4431_v33 = vmov 0.0   ;;  %vm579_vm3 = vcmask 195712   ;;  %s2678_s29 = sshll.u32 %s3105_s16, 7 }
  0x7d   : > { %v394_v17 = vsel %vm303_vm0, %v251_v15, 0.0  ;;  %2706 = vmatprep.subr.bf16.mxu0 %v4431_v33  ;;  %2714 = vmatprep.subr.bf16.mxu1 %v4431_v33  ;;  %vm586_vm4 = vcmask 261312   ;;  %vm721_vm5 = vcmask 1041409   ;;  %vm723_vm6 = vcmask 1042434   ;;  %s218_s30 = scalar_lea.vmem [#allocation8], %s2653_s20  ;;  %s4380_s22 = scalar_lea.hbm %s4427_s3, %s2678_s29 }
  0x7e   : > { %2707 = vmatpush3.bf16.msra.mxu0 %v2838_v32  ;;  %2710 = vmatprep.mubr.msk.bf16.mxu0 %vm3059_vm1, %v4431_v33  ;;  %vm725_vm7 = vcmask 1043459   ;;  %vm727_vm8 = vcmask 1044484   ;;  %vm729_vm9 = vcmask 1045509   ;;  %vm731_vm10 = vcmask 1046534   ;;  %s2551_s24 = sshll.u32 %s218_s30, 4  ;;  %s2538_s11 = scalar_lea.sflag [#allocation4], %s3262_s4  ;;  %s4382_s24 = int_to_ptr.vmem [resolvable:$true] %s2551_s24 }
  0x7f   : > { %326 = vadd.xlane.f32.xlu1 %v325_v19  ;;  %v499_v19 = vsel %vm303_vm0, %v243_v55, -inf  ;;  %2708 = vmatprep.subr.bf16.mxu0 %v4431_v33  ;;  %vm733_vm11 = vcmask 1047559   ;;  %vm941_vm12 = vcmask 261120   ;;  %vm1839_vm13 = vcmask 1040384   ;;  %s2979_s16 = scalar_lea.vmem %s4382_s24, 128  ;;  %p4494_p0 = scmp.ne.s32.totalorder %s4461_s23, 0 }
  0x80   : > { %314 = vadd.xlane.f32.xlu0 %v313_v20  ;;  %v490_v20 = vsel %vm303_vm0, %v240_v56, -inf  ;;  %2730 = vmatprep.mubr.msk.bf16.mxu1 %vm3059_vm1, %v4431_v33  ;;  %vm1835_vm14 = vcmask 801792   ;;  %p2980_p11 = scmp.ne.s32.totalorder %s4382_s24, %s2979_s16  ;;  %s3063_s25 = smov [#allocation8]  }
  0x81   : > { %s2983_s10 = sshll.u32 %s3063_s25, 4  ;;  %s2984_s10 = int_to_ptr.vmem [resolvable:$false] %s2983_s10 }
  0x82   : > { %p2981_p1 = pnand %p2980_p11, %p4494_p0  ;;  %s2985_s17 = scalar_lea.vmem %s2984_s10, 256 }
  0x83   : > { %341 = vadd.xlane.f32.xlu1 %v340_v22  ;;  %v505_v22 = vsel %vm303_vm0, %v245_v60, -inf  ;;  %p2986_p5 = scmp.lt.s32.totalorder %s4382_s24, %s2984_s10  ;;  %p2987_p9 = scmp.lt.s32.totalorder %s2985_s17, %s2979_s16 }
  0x84   : > { %335 = vadd.xlane.f32.xlu0 %v334_v23  ;;  %v252_v23 = vld [vmem:[%s3266_s8 + $0xf8] sm:$0xff]  ;;  %p2982_p3 = pneg %p2981_p1 }
  0x85   : > { %p2988_p12 = por %p2987_p9, %p2986_p5 }
  0x87   : > { %434 = vmax.xlane.f32.xlu1 %v433_v25  ;;  %v397_v25 = vsel %vm303_vm0, %v252_v23, 0.0  ;;  %p2989_p2 = pnand %p2988_p12, %p2982_p3 }
  0x88   : > { %344 = vadd.xlane.f32.xlu0 %v343_v26  ;;  %v517_v26 = vsel %vm303_vm0, %v249_v8, -inf }
  0x8b   : > { %446 = vmax.xlane.f32.xlu1 %v445_v27  ;;  %v511_v27 = vsel %vm303_vm0, %v247_v3, -inf }
  0x8c   : > { %437 = vmax.xlane.f32.xlu0 %v436_v28  ;;  %v514_v28 = vsel %vm303_vm0, %v248_v16, -inf }
  0x8f   : > { %338 = vadd.xlane.f32.xlu1 %v337_v30  ;;  %v523_v30 = vsel %vm303_vm0, %v251_v15, -inf  ;;  %v561_v15 = vlaneseq }
  0x90   : > { %449 = vmax.xlane.f32.xlu0 %v448_v31  ;;  %v526_v31 = vsel %vm303_vm0, %v252_v23, -inf }
  0x93   : > { %353 = vadd.xlane.f32.xlu1 %v352_v34  ;;  %v2839_v34 = vld [vmem:[#allocation5 + $0x8] sm:$0xff]  }
  0x94   : > { %347 = vadd.xlane.f32.xlu0 %v346_v35  ;;  %2709 = vmatpush3.bf16.msra.mxu0 %v2839_v34 }
  0x95   : > { %2734 = vmatprep.subr.bf16.mxu0 %v4431_v33 }
  0x97   : > { %440 = vmax.xlane.f32.xlu1 %v439_v37 }
  0x98   : > { %356 = vadd.xlane.f32.xlu0 %v355_v38 }
  0x9b   : > { %458 = vmax.xlane.f32.xlu1 %v457_v39  ;;  %v2840_v39 = vld [vmem:[#allocation5 + $0x10] sm:$0xff]  }
  0x9c   : > { %452 = vmax.xlane.f32.xlu0 %v451_v40  ;;  %2715 = vmatpush3.bf16.msra.mxu1 %v2840_v39  ;;  %v2841_v40 = vld [vmem:[#allocation5 + $0x18] sm:$0xff]  }
  0x9d   : > { %2716 = vmatprep.subr.bf16.mxu1 %v4431_v33 }
  0x9f   : > { %350 = vadd.xlane.f32.xlu1 %v349_v42 }
  0xa0   : > { %461 = vmax.xlane.f32.xlu0 %v460_v43  ;;  %2717 = vmatpush3.bf16.msra.mxu1 %v2841_v40  ;;  %v2842_v43 = vld [vmem:[#allocation5 + $0x20] sm:$0xff]  }
  0xa1   : > { %2718 = vmatprep.subr.bf16.mxu1 %v4431_v33 }
  0xa3   : > { %365 = vadd.xlane.f32.xlu1 %v364_v46  ;;  %v2843_v46 = vld [vmem:[#allocation5 + $0x28] sm:$0xff]  }
  0xa4   : > { %359 = vadd.xlane.f32.xlu0 %v358_v47  ;;  %2719 = vmatpush3.bf16.msra.mxu1 %v2842_v43 }
  0xa5   : > { %2720 = vmatprep.subr.bf16.mxu1 %v4431_v33 }
  0xa7   : > { %443 = vmax.xlane.f32.xlu1 %v442_v49  ;;  %v2844_v49 = vld [vmem:[#allocation5 + $0x30] sm:$0xff]  }
  0xa8   : > { %368 = vadd.xlane.f32.xlu0 %v367_v50  ;;  %2721 = vmatpush3.bf16.msra.mxu1 %v2843_v46 }
  0xa9   : > { %2722 = vmatprep.subr.bf16.mxu1 %v4431_v33 }
  0xab   : > { %464 = vmax.xlane.f32.xlu1 %v463_v51 }
  0xac   : > { %455 = vmax.xlane.f32.xlu0 %v454_v52  ;;  %2723 = vmatpush3.bf16.msra.mxu1 %v2844_v49  ;;  %v2845_v52 = vld [vmem:[#allocation5 + $0x38] sm:$0xff]  }
  0xad   : > { %2724 = vmatprep.subr.bf16.mxu1 %v4431_v33 }
  0xaf   : > { %473 = vmax.xlane.f32.xlu1 %v472_v53 }
  0xb0   : > { %470 = vmax.xlane.f32.xlu0 %v469_v54  ;;  %2725 = vmatpush3.bf16.msra.mxu1 %v2845_v52 }
  0xb1   : > { %2726 = vmatprep.subr.bf16.mxu1 %v4431_v33 }
  0xb3   : > { %371 = vadd.xlane.f32.xlu1 %v370_v57 }
  0xb4   : > { %362 = vadd.xlane.f32.xlu0 %v361_v58 }
  0xb7   : > { %380 = vadd.xlane.f32.xlu1 %v379_v61 }
  0xb8   : > { %377 = vadd.xlane.f32.xlu0 %v376_v62 }
  0xbb   : > { %476 = vmax.xlane.f32.xlu1 %v475_v63 }
  0xbc   : > { %467 = vmax.xlane.f32.xlu0 %v466_v0 }
  0xbf   : > { %485 = vmax.xlane.f32.xlu1 %v484_v1 }
  0xc0   : > { %482 = vmax.xlane.f32.xlu0 %v481_v2 }
  0xc3   : > { %383 = vadd.xlane.f32.xlu1 %v382_v5 }
  0xc4   : > { %374 = vadd.xlane.f32.xlu0 %v373_v6 }
  0xc7   : > { %392 = vadd.xlane.f32.xlu1 %v391_v9 }
  0xc8   : > { %389 = vadd.xlane.f32.xlu0 %v388_v10 }
  0xcb   : > { %488 = vmax.xlane.f32.xlu1 %v487_v11 }
  0xcc   : > { %479 = vmax.xlane.f32.xlu0 %v478_v12 }
  0xcf   : > { %497 = vmax.xlane.f32.xlu1 %v496_v13 }
  0xd0   : > { %494 = vmax.xlane.f32.xlu0 %v493_v14 }
  0xd3   : > { %395 = vadd.xlane.f32.xlu1 %v394_v17 }
  0xd4   : > { %386 = vadd.xlane.f32.xlu0 %v385_v18  ;;  %v562_v18 = vand.u32 127, %v561_v15 }
  0xd6   : > { %v574_v23 = vadd.s32 4294967280, %v562_v18 }
  0xd7   : > { %500 = vmax.xlane.f32.xlu1 %v499_v19 }
  0xd8   : > { %491 = vmax.xlane.f32.xlu0 %v490_v20 }
  0xdb   : > { %509 = vmax.xlane.f32.xlu1 %v508_v21  ;;  %v567_v21 = vadd.s32 4294967288, %v562_v18 }
  0xdc   : > { %506 = vmax.xlane.f32.xlu0 %v505_v22  ;;  %v3468_v22 = vshrl.u32 %v561_v15, 7 }
  0xde   : > { %4466 = vst [vmem:[#allocation12_spill] sm:$0xff] %v3468_v22  ;;  %v3485_v34 = vsub.s32 %v574_v23, %v3468_v22 }
  0xdf   : > { %503 = vmax.xlane.f32.xlu1 %v502_v24 }
  0xe0   : > { %398 = vadd.xlane.f32.xlu0 %v397_v25  ;;  %4469 = vst [vmem:[#allocation15_spill] sm:$0xff] %v3485_v34 }
  0xe3   : > { %518 = vmax.xlane.f32.xlu1 %v517_v26  ;;  %v581_v26 = vadd.s32 4294967272, %v562_v18 }
  0xe4   : > { %512 = vmax.xlane.f32.xlu0 %v511_v27  ;;  %v3475_v27 = vsub.s32 %v567_v21, %v3468_v22 }
  0xe6   : > { %4467 = vst [vmem:[#allocation13_spill] sm:$0xff] %v3475_v27 }
  0xe7   : > { %515 = vmax.xlane.f32.xlu1 %v514_v28 }
  0xe8   : > { %521 = vmax.xlane.f32.xlu0 %v520_v29  ;;  %v3479_v29 = vsub.s32 %v562_v18, %v3468_v22 }
  0xea   : > { %4468 = vst [vmem:[#allocation14_spill] sm:$0xff] %v3479_v29 }
  0xeb   : > { %527 = vmax.xlane.f32.xlu1 %v526_v31 }
  0xec   : > { %524 = vmax.xlane.f32.xlu0 %v523_v30 }
  0xfc   : > { %v3375_v35 = vpop.xlane.xlu1 %317 }
  0xfd   : > { %v3377_v36 = vpop.xlane.xlu0 %305  ;;  %v405_v30 = vmul.f32 0.020408163, %v3375_v35  ;;  %v3496_v35 = vsub.s32 %v581_v26, %v3468_v22 }
  0xfe   : > { %v401_v32 = vmul.f32 0.020408163, %v3377_v36 }
  0xff   : > { %4470 = vst [vmem:[#allocation16_spill] sm:$0xff] %v3496_v35 }
 0x100   : > { %v3384_v37 = vpop.xlane.xlu1 %320 }
 0x101   : > { %v3386_v38 = vpop.xlane.xlu0 %308  ;;  %v406_v28 = vmul.f32 0.020408163, %v3384_v37 }
 0x102   : > { %v402_v31 = vmul.f32 0.020408163, %v3386_v38 }
 0x103   : > { %v595_v38 = vrot.slane %v406_v28, %v3475_v27 }
 0x104   : > { %v3389_v41 = vpop.xlane.xlu1 %323  ;;  %v571_v52 = vrot.slane %v402_v31, %v3475_v27 }
 0x105   : > { %v3391_v42 = vpop.xlane.xlu0 %311  ;;  %v407_v39 = vmul.f32 0.020408163, %v3389_v41 }
 0x106   : > { %v403_v40 = vmul.f32 0.020408163, %v3391_v42  ;;  %v591_v42 = vrot.slane %v405_v30, %v3479_v29 }
 0x108   : > { %v3394_v44 = vpop.xlane.xlu1 %332  ;;  %v578_v18 = vrot.slane %v403_v40, %v3485_v34 }
 0x109   : > { %v3396_v45 = vpop.xlane.xlu0 %329  ;;  %v410_v37 = vmul.f32 0.020408163, %v3394_v44  ;;  %v566_v44 = vrot.slane %v401_v32, %v3479_v29 }
 0x10a   : > { %v409_v49 = vmul.f32 0.020408163, %v3396_v45  ;;  %v600_v45 = vrot.slane %v407_v39, %v3485_v34 }
 0x10c   : > { %v3399_v47 = vpop.xlane.xlu1 %326  ;;  %v610_v26 = vrot.slane %v409_v49, %v3479_v29 }
 0x10d   : > { %v3401_v48 = vpop.xlane.xlu0 %314  ;;  %v408_v36 = vmul.f32 0.020408163, %v3399_v47 }
 0x10e   : > { %v404_v41 = vmul.f32 0.020408163, %v3401_v48  ;;  %v614_v48 = vrot.slane %v410_v37, %v3475_v27 }
 0x10f   : > { %v605_v28 = vrot.slane %v408_v36, %v3496_v35 }
 0x110   : > { %v3404_v50 = vpop.xlane.xlu1 %341  ;;  %v585_v31 = vrot.slane %v404_v41, %v3496_v35  ;;  %v615_v41 = vsel %vm572_vm2, %v614_v48, %v610_v26 }
 0x111   : > { %v3406_v51 = vpop.xlane.xlu0 %335  ;;  %v413_v32 = vmul.f32 0.020408163, %v3404_v50 }
 0x112   : > { %v411_v15 = vmul.f32 0.020408163, %v3406_v51  ;;  %v596_v51 = vsel %vm572_vm2, %v595_v38, %v591_v42 }
 0x113   : > { %v601_v37 = vsel %vm579_vm3, %v600_v45, %v596_v51 }
 0x114   : > { %v3409_v53 = vpop.xlane.xlu1 %434  ;;  %v619_v39 = vrot.slane %v411_v15, %v3485_v34  ;;  %v606_v42 = vsel %vm586_vm4, %v605_v28, %v601_v37 }
 0x115   : > { %v3411_v54 = vpop.xlane.xlu0 %344 }
 0x116   : > { %v414_v30 = vmul.f32 0.020408163, %v3411_v54 }
 0x118   : > { %v3414_v55 = vpop.xlane.xlu1 %446  ;;  %v633_v50 = vrot.slane %v414_v30, %v3475_v27 }
 0x119   : > { %v3416_v56 = vpop.xlane.xlu0 %437  ;;  %v790_v28 = vrot.slane %v3414_v55, %v3479_v29 }
 0x11a   : > { %v775_v15 = vrot.slane %v3416_v56, %v3475_v27 }
 0x11c   : > { %v339_v57 = vpop.xlane.xlu1 %338 }
 0x11d   : > { %v3418_v58 = vpop.xlane.xlu0 %449  ;;  %v412_v21 = vmul.f32 0.020408163, %v339_v57  ;;  %v573_v57 = vsel %vm572_vm2, %v571_v52, %v566_v44 }
 0x11e   : > { %v580_v49 = vsel %vm579_vm3, %v578_v18, %v573_v57  ;;  %v794_v44 = vrot.slane %v3418_v58, %v3475_v27  ;;  %v629_v18 = vrot.slane %v413_v32, %v3479_v29 }
 0x11f   : > { %v624_v54 = vrot.slane %v412_v21, %v3496_v35  ;;  %v620_v21 = vsel %vm579_vm3, %v619_v39, %v615_v41 }
 0x120   : > { %v3420_v59 = vpop.xlane.xlu1 %353  ;;  %v795_v55 = vsel %vm572_vm2, %v794_v44, %v790_v28 }
 0x121   : > { %v3422_v60 = vpop.xlane.xlu0 %347  ;;  %v417_v48 = vmul.f32 0.020408163, %v3420_v59  ;;  %v625_v56 = vsel %vm586_vm4, %v624_v54, %v620_v21  ;;  %v634_v59 = vsel %vm572_vm2, %v633_v50, %v629_v18 }
 0x122   : > { %v415_v40 = vmul.f32 0.020408163, %v3422_v60  ;;  %v587_v60 = vsel %vm586_vm4, %v585_v31, %v580_v49 }
 0x123   : > { %v722_v51 = vsel %vm721_vm5, %v606_v42, %v587_v60  ;;  %v648_v39 = vrot.slane %v417_v48, %v3479_v29 }
 0x124   : > { %v3424_v61 = vpop.xlane.xlu1 %440  ;;  %v638_v26 = vrot.slane %v415_v40, %v3485_v34  ;;  %v724_v32 = vsel %vm723_vm6, %v625_v56, %v722_v51 }
 0x125   : > { %v3426_v62 = vpop.xlane.xlu0 %356  ;;  %v780_v58 = vrot.slane %v3424_v61, %v3485_v34 }
 0x126   : > { %v418_v45 = vmul.f32 0.020408163, %v3426_v62  ;;  %v639_v40 = vsel %vm579_vm3, %v638_v26, %v634_v59 }
 0x128   : > { %v3428_v63 = vpop.xlane.xlu1 %458  ;;  %v652_v57 = vrot.slane %v418_v45, %v3475_v27 }
 0x129   : > { %v3430_v0 = vpop.xlane.xlu0 %452  ;;  %v809_v54 = vrot.slane %v3428_v63, %v3479_v29 }
 0x12a   : > { %v799_v61 = vrot.slane %v3430_v0, %v3485_v34  ;;  %v653_v63 = vsel %vm572_vm2, %v652_v57, %v648_v39 }
 0x12c   : > { %v3432_v1 = vpop.xlane.xlu1 %350 }
 0x12d   : > { %v3434_v2 = vpop.xlane.xlu0 %461  ;;  %v416_v52 = vmul.f32 0.020408163, %v3432_v1  ;;  %v771_v1 = vrot.slane %v3409_v53, %v3479_v29 }
 0x12e   : > { %v813_v37 = vrot.slane %v3434_v2, %v3475_v27 }
 0x12f   : > { %v643_v31 = vrot.slane %v416_v52, %v3496_v35  ;;  %v776_v53 = vsel %vm572_vm2, %v775_v15, %v771_v1 }
 0x130   : > { %v3436_v3 = vpop.xlane.xlu1 %365  ;;  %v781_v49 = vsel %vm579_vm3, %v780_v58, %v776_v53  ;;  %v814_v45 = vsel %vm572_vm2, %v813_v37, %v809_v54 }
 0x131   : > { %v3438_v4 = vpop.xlane.xlu0 %359  ;;  %v421_v41 = vmul.f32 0.020408163, %v3436_v3  ;;  %v644_v52 = vsel %vm586_vm4, %v643_v31, %v639_v40  ;;  %v800_v3 = vsel %vm579_vm3, %v799_v61, %v795_v55 }
 0x132   : > { %v419_v42 = vmul.f32 0.020408163, %v3438_v4  ;;  %v3591_v21 = vsel %vm725_vm7, %v644_v52, %v724_v32 }
 0x134   : > { %v3440_v5 = vpop.xlane.xlu1 %443  ;;  %v657_v48 = vrot.slane %v419_v42, %v3485_v34 }
 0x135   : > { %v3442_v6 = vpop.xlane.xlu0 %368  ;;  %v785_v60 = vrot.slane %v3440_v5, %v3496_v35 }
 0x136   : > { %v422_v2 = vmul.f32 0.020408163, %v3442_v6  ;;  %v658_v37 = vsel %vm579_vm3, %v657_v48, %v653_v63 }
 0x138   : > { %v3444_v7 = vpop.xlane.xlu1 %464 }
 0x139   : > { %v3446_v8 = vpop.xlane.xlu0 %455  ;;  %v818_v15 = vrot.slane %v3444_v7, %v3485_v34  ;;  %v667_v7 = vrot.slane %v421_v41, %v3479_v29 }
 0x13a   : > { %v804_v4 = vrot.slane %v3446_v8, %v3496_v35 }
 0x13c   : > { %v3448_v9 = vpop.xlane.xlu1 %473  ;;  %v805_v28 = vsel %vm586_vm4, %v804_v4, %v800_v3 }
 0x13d   : > { %v3450_v10 = vpop.xlane.xlu0 %470  ;;  %v832_v56 = vrot.slane %v3448_v9, %v3475_v27 }
 0x140   : > { %v3452_v11 = vpop.xlane.xlu1 %371 }
 0x141   : > { %v3454_v12 = vpop.xlane.xlu0 %362  ;;  %v423_v44 = vmul.f32 0.020408163, %v3452_v11 }
 0x142   : > { %v420_v18 = vmul.f32 0.020408163, %v3454_v12  ;;  %v786_v12 = vsel %vm586_vm4, %v785_v60, %v781_v49 }
 0x143   : > { %v676_v58 = vrot.slane %v423_v44, %v3485_v34  ;;  %v920_v49 = vsel %vm721_vm5, %v805_v28, %v786_v12 }
 0x144   : > { %v3456_v13 = vpop.xlane.xlu1 %380  ;;  %v662_v51 = vrot.slane %v420_v18, %v3496_v35 }
 0x145   : > { %v3458_v14 = vpop.xlane.xlu0 %377  ;;  %v426_v5 = vmul.f32 0.020408163, %v3456_v13  ;;  %v671_v13 = vrot.slane %v422_v2, %v3475_v27 }
 0x146   : > { %v425_v6 = vmul.f32 0.020408163, %v3458_v14  ;;  %v819_v14 = vsel %vm579_vm3, %v818_v15, %v814_v45 }
 0x147   : > { %v690_v59 = vrot.slane %v426_v5, %v3475_v27  ;;  %v672_v32 = vsel %vm572_vm2, %v671_v13, %v667_v7 }
 0x148   : > { %v3460_v16 = vpop.xlane.xlu1 %476  ;;  %v686_v31 = vrot.slane %v425_v6, %v3479_v29 }
 0x149   : > { %v3462_v17 = vpop.xlane.xlu0 %467  ;;  %v837_v53 = vrot.slane %v3460_v16, %v3485_v34 }
 0x14a   : > { %v823_v8 = vrot.slane %v3462_v17, %v3496_v35  ;;  %v828_v17 = vrot.slane %v3450_v10, %v3479_v29  ;;  %v691_v54 = vsel %vm572_vm2, %v690_v59, %v686_v31 }
 0x14c   : > { %v3464_v19 = vpop.xlane.xlu1 %485 }
 0x14d   : > { %v3466_v20 = vpop.xlane.xlu0 %482  ;;  %v851_v55 = vrot.slane %v3464_v19, %v3475_v27  ;;  %v833_v19 = vsel %vm572_vm2, %v832_v56, %v828_v17 }
 0x14e   : > { %v847_v9 = vrot.slane %v3466_v20, %v3479_v29  ;;  %v677_v20 = vsel %vm579_vm3, %v676_v58, %v672_v32  ;;  %v838_v41 = vsel %vm579_vm3, %v837_v53, %v833_v19 }
 0x150   : > { %v3470_v24 = vpop.xlane.xlu1 %383 }
 0x151   : > { %v3472_v25 = vpop.xlane.xlu0 %374  ;;  %v427_v1 = vmul.f32 0.020408163, %v3470_v24  ;;  %v824_v24 = vsel %vm586_vm4, %v823_v8, %v819_v14 }
 0x152   : > { %v424_v10 = vmul.f32 0.020408163, %v3472_v25  ;;  %v663_v25 = vsel %vm586_vm4, %v662_v51, %v658_v37  ;;  %v921_v42 = vsel %vm723_vm6, %v824_v24, %v920_v49 }
 0x153   : > { %v695_v39 = vrot.slane %v427_v1, %v3485_v34 }
 0x154   : > { %v3489_v43 = vpop.xlane.xlu1 %392 }
 0x155   : > { %v3491_v46 = vpop.xlane.xlu0 %389  ;;  %v430_v40 = vmul.f32 0.020408163, %v3489_v43  ;;  %v852_v43 = vsel %vm572_vm2, %v851_v55, %v847_v9  ;;  %v696_v63 = vsel %vm579_vm3, %v695_v39, %v691_v54  ;;  %v728_v39 = vsel %vm727_vm8, %v663_v25, %v3591_v21 }
 0x156   : > { %v429_v16 = vmul.f32 0.020408163, %v3491_v46  ;;  %v681_v46 = vrot.slane %v424_v10, %v3496_v35 }
 0x157   : > { %v709_v3 = vrot.slane %v430_v40, %v3475_v27 }
 0x158   : > { %v3507_v47 = vpop.xlane.xlu1 %488  ;;  %v705_v4 = vrot.slane %v429_v16, %v3479_v29 }
 0x159   : > { %v3509_v23 = vpop.xlane.xlu0 %479  ;;  %v856_v45 = vrot.slane %v3507_v47, %v3485_v34 }
 0x15a   : > { %v842_v52 = vrot.slane %v3509_v23, %v3496_v35 }
 0x15c   : > { %v3524_v36 = vpop.xlane.xlu1 %497  ;;  %v843_v7 = vsel %vm586_vm4, %v842_v52, %v838_v41  ;;  %v2847_v52 = vld [vmem:[#allocation5 + $0x48] sm:$0xff]  }
 0x15d   : > { %v3526_v38 = vpop.xlane.xlu0 %494  ;;  %v870_v18 = vrot.slane %v3524_v36, %v3475_v27  ;;  %v922_v56 = vsel %vm725_vm7, %v843_v7, %v921_v42 }
 0x15e   : > { %v866_v23 = vrot.slane %v3526_v38, %v3479_v29 }
 0x160   : > { %v3549_v62 = vpop.xlane.xlu1 %395  ;;  %v871_v14 = vsel %vm572_vm2, %v870_v18, %v866_v23  ;;  %v296_v23 = vld [vmem:[#allocation7 + $0x30] sm:$0xff] }
 0x161   : > { %v3551_v30 = vpop.xlane.xlu0 %386  ;;  %v431_v60 = vmul.f32 0.020408163, %v3549_v62 }
 0x162   : > { %v428_v44 = vmul.f32 0.020408163, %v3551_v30 }
 0x163   : > { %v714_v36 = vrot.slane %v431_v60, %v3485_v34  ;;  %v294_v60 = vld [vmem:[#allocation7 + $0x20] sm:$0xff] }
 0x164   : > { %v3571_v50 = vpop.xlane.xlu1 %500  ;;  %v700_v13 = vrot.slane %v428_v44, %v3496_v35 }
 0x165   : > { %v3573_v0 = vpop.xlane.xlu0 %491  ;;  %v875_v5 = vrot.slane %v3571_v50, %v3485_v34  ;;  %v682_v50 = vsel %vm586_vm4, %v681_v46, %v677_v20  ;;  %v2846_v46 = vld [vmem:[#allocation5 + $0x40] sm:$0xff]  }
 0x166   : > { %v861_v6 = vrot.slane %v3573_v0, %v3496_v35  ;;  %v710_v0 = vsel %vm572_vm2, %v709_v3, %v705_v4  ;;  %v701_v10 = vsel %vm586_vm4, %v700_v13, %v696_v63  ;;  %v730_v49 = vsel %vm729_vm9, %v682_v50, %v728_v39  ;;  %2727 = vmatpush3.bf16.msra.mxu1 %v2846_v46 }
 0x167   : > { %v876_v17 = vsel %vm579_vm3, %v875_v5, %v871_v14  ;;  %v715_v59 = vsel %vm579_vm3, %v714_v36, %v710_v0  ;;  %v732_v54 = vsel %vm731_vm10, %v701_v10, %v730_v49  ;;  %2728 = vmatprep.subr.bf16.mxu1 %v4431_v33  ;;  %v297_v5 = vld [vmem:[#allocation7 + $0x38] sm:$0xff]  ;;  %v1104_v13 = vsub.s32 1, %v3468_v22 }
 0x168   : > { %v3597_v26 = vpop.xlane.xlu1 %509 }
 0x169   : > { %v3599_v11 = vpop.xlane.xlu0 %506  ;;  %v889_v30 = vrot.slane %v3597_v26, %v3475_v27 }
 0x16a   : > { %v885_v47 = vrot.slane %v3599_v11, %v3479_v29  ;;  %v857_v11 = vsel %vm579_vm3, %v856_v45, %v852_v43  ;;  %2729 = vmatpush3.bf16.msra.mxu1 %v2847_v52 }
 0x16b   : > { %v862_v58 = vsel %vm586_vm4, %v861_v6, %v857_v11  ;;  %2752 = vmatprep.subr.bf16.mxu1 %v4431_v33 }
 0x16c   : > { %v504_v57 = vpop.xlane.xlu1 %503  ;;  %v890_v51 = vsel %vm572_vm2, %v889_v30, %v885_v47  ;;  %v923_v40 = vsel %vm727_vm8, %v862_v58, %v922_v56  ;;  %v1161_v56 = vsub.s32 4, %v3468_v22  ;;  %v1180_v58 = vsub.s32 5, %v3468_v22 }
 0x16d   : > { %v399_v61 = vpop.xlane.xlu0 %398  ;;  %v880_v38 = vrot.slane %v504_v57, %v3496_v35 }
 0x16e   : > { %v432_v62 = vmul.f32 0.020408163, %v399_v61 }
 0x16f   : > { %v881_v31 = vsel %vm586_vm4, %v880_v38, %v876_v17 }
 0x170   : > { %v519_v2 = vpop.xlane.xlu1 %518  ;;  %v719_v1 = vrot.slane %v432_v62, %v3496_v35  ;;  %v924_v19 = vsel %vm729_vm9, %v881_v31, %v923_v40  ;;  %v295_v62 = vld [vmem:[#allocation7 + $0x28] sm:$0xff] }
 0x171   : > { %v513_v15 = vpop.xlane.xlu0 %512  ;;  %v904_v53 = vrot.slane %v519_v2, %v3479_v29  ;;  %v3060_v2 = vmov 0  }
 0x172   : > { %v894_v48 = vrot.slane %v513_v15, %v3485_v34  ;;  %v720_v16 = vsel %vm586_vm4, %v719_v1, %v715_v59  ;;  %2836 = vset.pattern.permute.xlu1 %v3060_v2  ;;  %2837 = vset.pattern.permute.xlu0 %v3060_v2  ;;  %v1142_v1 = vsub.s32 3, %v3468_v22  ;;  %v1199_v59 = vsub.s32 6, %v3468_v22 }
 0x173   : > { %v734_v21 = vsel %vm733_vm11, %v720_v16, %v732_v54  ;;  %1461 = vperm.xlu1 %2836, %v294_v60   ;;  %1466 = vperm.xlu0 %2837, %v295_v62  }
 0x174   : > { %v516_v8 = vpop.xlane.xlu1 %515  ;;  %v895_v24 = vsel %vm579_vm3, %v894_v48, %v890_v51 }
 0x175   : > { %v522_v12 = vpop.xlane.xlu0 %521  ;;  %v899_v26 = vrot.slane %v516_v8, %v3496_v35 }
 0x176   : > { %v908_v28 = vrot.slane %v522_v12, %v3475_v27  ;;  %v3702_v12 = vsub.s32 0, %v3468_v22 }
 0x177   : > { %v900_v57 = vsel %vm586_vm4, %v899_v26, %v895_v24  ;;  %1471 = vperm.xlu1 %2836, %v296_v23   ;;  %1476 = vperm.xlu0 %2837, %v297_v5   ;;  %v1123_v26 = vsub.s32 2, %v3468_v22 }
 0x178   : > { %v528_v9 = vpop.xlane.xlu1 %527  ;;  %v909_v37 = vsel %vm572_vm2, %v908_v28, %v904_v53  ;;  %v925_v41 = vsel %vm731_vm10, %v900_v57, %v924_v19  ;;  %4471 = vst [vmem:[#allocation17_spill] sm:$0xff] %v3702_v12  ;;  %v1218_v53 = vsub.s32 7, %v3468_v22 }
 0x179   : > { %v525_v55 = vpop.xlane.xlu0 %524  ;;  %v918_v32 = vrot.slane %v528_v9, %v3496_v35 }
 0x17a   : > { %v913_v61 = vrot.slane %v525_v55, %v3485_v34 }
 0x17c   : > { %v914_v20 = vsel %vm579_vm3, %v913_v61, %v909_v37  ;;  %v3720_v61 = vld [vmem:[#allocation7 + $0x8] sm:$0xff] }
 0x17d   : > { %v919_v42 = vsel %vm586_vm4, %v918_v32, %v914_v20  ;;  %v3722_v32 = vld [vmem:[#allocation7] sm:$0xff] }
 0x17e   : > { %v926_v25 = vsel %vm733_vm11, %v919_v42, %v925_v41 }
 0x17f   : > { %v928_v43 = vpack.c.bf16 %v926_v25, %v734_v21  ;;  %v3729_v25 = vld [vmem:[#allocation7 + $0x10] sm:$0xff] }
 0x181   : > { %2711 = vmatmul.mubr.msk.bf16.vlgmr.msra.gmra.mrb[0].mxu0 %vm941_vm12, %v928_v43 }
 0x182   : > { %2748 = vmatprep.mubr.msk.bf16.mxu0 %vm3059_vm1, %v4431_v33 }
 0x1f2   : > { %v3712_v55 = vpop.permute.xlu0 %1466  ;;  %v3714_v9 = vpop.permute.xlu1 %1461 }
 0x1f3   : > { %4472 = vst [vmem:[#allocation18_spill] sm:$0xff] %v3712_v55  ;;  %4473 = vst [vmem:[#allocation19_spill] sm:$0xff] %v3714_v9 }
 0x1f6   : > { %v3716_v10 = vpop.permute.xlu0 %1476  ;;  %v3718_v57 = vpop.permute.xlu1 %1471 }
 0x1f7   : > { %4474 = vst [vmem:[#allocation20_spill] sm:$0xff] %v3716_v10  ;;  %4475 = vst [vmem:[#allocation21_spill] sm:$0xff] %v3718_v57 }
 0x254   : > { %v979_v15 = vpop.f32.mrb[0].mxu0 }
 0x255   : > { %v2712_v63 = vpop.f32.mrb[1].mxu0  ;;  %v986_v4 = vmax.f32 %v979_v15, 0.0 }
 0x256   : > { %v982_v3 = vpop.f32.mrb[2].mxu0 }
 0x257   : > { %v987_v44 = vmax.f32 %v982_v3, 0.0  ;;  %v2713_v45 = vpop.f32.mrb[3].mxu0 }
 0x259   : > { %v988_v18 = vpack.c.bf16 %v987_v44, %v986_v4 }
 0x25b   : > { %2731 = vmatmul.mubr.bf16.vlgmr.msra.gmra.mrb[0].mxu1 %v988_v18 }
 0x25c   : > { %2756 = vmatprep.mubr.msk.bf16.mxu1 %vm3059_vm1, %v4431_v33 }
 0x32e   : > { %v1071_v6 = vpop.f32.mrb[0].mxu1 }
 0x32f   : > { %v2732_v30 = vpop.f32.mrb[1].mxu1 }
 0x330   : > { %v1074_v47 = vpop.f32.mrb[2].mxu1  ;;  %v3739_v30 = vld [vmem:[#allocation7 + $0x18] sm:$0xff] }
 0x331   : > { %v1078_v7 = vadd.f32 %v1074_v47, %v1071_v6  ;;  %v2733_v36 = vpop.f32.mrb[3].mxu1 }
 0x333   : > { %v1079_v38 = vmul.f32 0.5, %v1078_v7 }
 0x335   : > { %2857 = vtanh.f32 %v1079_v38 }
 0x33f   : > { %v2858_v48 = vpop.eup %2857 }
 0x340   : > { %v1081_v8 = vadd.f32 1.0, %v2858_v48 }
 0x342   : > { %v1082_v50 = vmul.f32 0.5, %v1081_v8 }
 0x344   : > { %v1086_v0 = vrot.slane %v1082_v50, %v3702_v12  ;;  %v1105_v11 = vrot.slane %v1082_v50, %v1104_v13  ;;  %v1124_v14 = vrot.slane %v1082_v50, %v1123_v26  ;;  %v1143_v28 = vrot.slane %v1082_v50, %v1142_v1 }
 0x345   : > { %v1162_v17 = vrot.slane %v1082_v50, %v1161_v56  ;;  %v1181_v51 = vrot.slane %v1082_v50, %v1180_v58  ;;  %v1200_v31 = vrot.slane %v1082_v50, %v1199_v59  ;;  %v1219_v24 = vrot.slane %v1082_v50, %v1218_v53 }
 0x346   : > { %1092 = vbcast.lane.b32.xlu1 %v1086_v0, 264  ;;  %1088 = vbcast.lane.b32.xlu0 %v1086_v0, 256 }
 0x34a   : > { %1107 = vbcast.lane.b32.xlu1 %v1105_v11, 256  ;;  %1126 = vbcast.lane.b32.xlu0 %v1124_v14, 256 }
 0x34e   : > { %1111 = vbcast.lane.b32.xlu1 %v1105_v11, 264  ;;  %1096 = vbcast.lane.b32.xlu0 %v1086_v0, 272 }
 0x352   : > { %1130 = vbcast.lane.b32.xlu1 %v1124_v14, 264  ;;  %1145 = vbcast.lane.b32.xlu0 %v1143_v28, 256 }
 0x356   : > { %1115 = vbcast.lane.b32.xlu1 %v1105_v11, 272  ;;  %1134 = vbcast.lane.b32.xlu0 %v1124_v14, 272 }
 0x35a   : > { %1149 = vbcast.lane.b32.xlu1 %v1143_v28, 264  ;;  %1168 = vbcast.lane.b32.xlu0 %v1162_v17, 264 }
 0x35e   : > { %1164 = vbcast.lane.b32.xlu1 %v1162_v17, 256  ;;  %1119 = vbcast.lane.b32.xlu0 %v1105_v11, 280 }
 0x362   : > { %1100 = vbcast.lane.b32.xlu1 %v1086_v0, 280  ;;  %1183 = vbcast.lane.b32.xlu0 %v1181_v51, 256 }
 0x366   : > { %1153 = vbcast.lane.b32.xlu1 %v1143_v28, 272  ;;  %1138 = vbcast.lane.b32.xlu0 %v1124_v14, 280 }
 0x36a   : > { %1187 = vbcast.lane.b32.xlu1 %v1181_v51, 264  ;;  %1202 = vbcast.lane.b32.xlu0 %v1200_v31, 256 }
 0x36e   : > { %1172 = vbcast.lane.b32.xlu1 %v1162_v17, 272  ;;  %1157 = vbcast.lane.b32.xlu0 %v1143_v28, 280 }
 0x372   : > { %1206 = vbcast.lane.b32.xlu1 %v1200_v31, 264  ;;  %1221 = vbcast.lane.b32.xlu0 %v1219_v24, 256 }
 0x376   : > { %1191 = vbcast.lane.b32.xlu1 %v1181_v51, 272  ;;  %1176 = vbcast.lane.b32.xlu0 %v1162_v17, 280 }
 0x37a   : > { %1225 = vbcast.lane.b32.xlu1 %v1219_v24, 264  ;;  %1195 = vbcast.lane.b32.xlu0 %v1181_v51, 280 }
 0x37e   : > { %1210 = vbcast.lane.b32.xlu1 %v1200_v31, 272  ;;  %1214 = vbcast.lane.b32.xlu0 %v1200_v31, 280 }
 0x382   : > { %1229 = vbcast.lane.b32.xlu1 %v1219_v24, 272 }
 0x386   : > { %1233 = vbcast.lane.b32.xlu1 %v1219_v24, 280 }
 0x3b8   : > { %v1093_v39 = vpop.permute.xlu1 %1092  ;;  %v1089_v40 = vpop.permute.xlu0 %1088 }
 0x3b9   : > { %v1236_v16 = vmul.f32 %v1093_v39, %v3720_v61  ;;  %v1235_v37 = vmul.f32 %v1089_v40, %v3722_v32 }
 0x3bb   : > { %1274 = vperm.xlu1 %2836, %v1236_v16   ;;  %1269 = vperm.xlu0 %2837, %v1235_v37  }
 0x3bc   : > { %v1108_v49 = vpop.permute.xlu1 %1107  ;;  %v1127_v19 = vpop.permute.xlu0 %1126 }
 0x3bd   : > { %v1239_v20 = vmul.f32 %v1108_v49, %v3722_v32  ;;  %v1243_v42 = vmul.f32 %v1127_v19, %v3722_v32 }
 0x3bf   : > { %1289 = vperm.xlu1 %2836, %v1239_v20  }
 0x3c0   : > { %v1112_v54 = vpop.permute.xlu1 %1111  ;;  %v1097_v41 = vpop.permute.xlu0 %1096 }
 0x3c1   : > { %v1240_v21 = vmul.f32 %v1112_v54, %v3720_v61  ;;  %v1237_v52 = vmul.f32 %v1097_v41, %v3729_v25 }
 0x3c3   : > { %1294 = vperm.xlu0 %2837, %v1240_v21   ;;  %1309 = vperm.xlu1 %2836, %v1243_v42  }
 0x3c4   : > { %v1131_v43 = vpop.permute.xlu1 %1130  ;;  %v1146_v46 = vpop.permute.xlu0 %1145 }
 0x3c5   : > { %v1244_v60 = vmul.f32 %v1131_v43, %v3720_v61  ;;  %v1247_v63 = vmul.f32 %v1146_v46, %v3722_v32 }
 0x3c7   : > { %1314 = vperm.xlu0 %2837, %v1244_v60   ;;  %1279 = vperm.xlu1 %2836, %v1237_v52  }
 0x3c8   : > { %v1116_v2 = vpop.permute.xlu1 %1115  ;;  %v1135_v15 = vpop.permute.xlu0 %1134 }
 0x3c9   : > { %v1241_v3 = vmul.f32 %v1116_v2, %v3729_v25  ;;  %v1245_v45 = vmul.f32 %v1135_v15, %v3729_v25  ;;  %v2848_v2 = vld [vmem:[#allocation5 + $0x50] sm:$0xff]   ;;  %v2849_v15 = vld [vmem:[#allocation5 + $0x58] sm:$0xff]  }
 0x3ca   : > { %2735 = vmatpush3.bf16.msra.mxu0 %v2848_v2 }
 0x3cb   : > { %1299 = vperm.xlu0 %2837, %v1241_v3   ;;  %1329 = vperm.xlu1 %2836, %v1247_v63   ;;  %v2850_v63 = vld [vmem:[#allocation5 + $0x60] sm:$0xff]   ;;  %v2851_v3 = vld [vmem:[#allocation5 + $0x68] sm:$0xff]  }
 0x3cc   : > { %v1150_v4 = vpop.permute.xlu1 %1149  ;;  %v1169_v44 = vpop.permute.xlu0 %1168  ;;  %2736 = vmatprep.subr.bf16.mxu0 %v4431_v33 }
 0x3cd   : > { %v1248_v18 = vmul.f32 %v1150_v4, %v3720_v61  ;;  %v1252_v5 = vmul.f32 %v1169_v44, %v3720_v61  ;;  %v2852_v4 = vld [vmem:[#allocation5 + $0x70] sm:$0xff]  }
 0x3ce   : > { %2737 = vmatpush3.bf16.msra.mxu0 %v2849_v15  ;;  %v2869_v15 = vld [vmem:[%s3266_s8 + $0x38] sm:$0xff] }
 0x3cf   : > { %1334 = vperm.xlu0 %2837, %v1248_v18   ;;  %1319 = vperm.xlu1 %2836, %v1245_v45  }
 0x3d0   : > { %v1165_v23 = vpop.permute.xlu1 %1164  ;;  %v1120_v62 = vpop.permute.xlu0 %1119  ;;  %2738 = vmatprep.subr.bf16.mxu0 %v4431_v33 }
 0x3d1   : > { %v1251_v6 = vmul.f32 %v1165_v23, %v3722_v32  ;;  %v1242_v36 = vmul.f32 %v1120_v62, %v3739_v30 }
 0x3d2   : > { %2739 = vmatpush3.bf16.msra.mxu0 %v2850_v63 }
 0x3d3   : > { %1349 = vperm.xlu0 %2837, %v1251_v6   ;;  %1354 = vperm.xlu1 %2836, %v1252_v5  }
 0x3d4   : > { %v1101_v47 = vpop.permute.xlu1 %1100  ;;  %v1184_v7 = vpop.permute.xlu0 %1183  ;;  %2740 = vmatprep.subr.bf16.mxu0 %v4431_v33 }
 0x3d5   : > { %v1238_v38 = vmul.f32 %v1101_v47, %v3739_v30  ;;  %v1255_v50 = vmul.f32 %v1184_v7, %v3722_v32 }
 0x3d6   : > { %2741 = vmatpush3.bf16.msra.mxu0 %v2851_v3  ;;  %v2870_v3 = vld [vmem:[%s3266_s8 + $0x18] sm:$0xff] }
 0x3d7   : > { %1284 = vperm.xlu0 %2837, %v1238_v38   ;;  %1304 = vperm.xlu1 %2836, %v1242_v36  }
 0x3d8   : > { %v1154_v48 = vpop.permute.xlu1 %1153  ;;  %v1139_v8 = vpop.permute.xlu0 %1138  ;;  %2742 = vmatprep.subr.bf16.mxu0 %v4431_v33 }
 0x3d9   : > { %v1249_v0 = vmul.f32 %v1154_v48, %v3729_v25  ;;  %v1246_v28 = vmul.f32 %v1139_v8, %v3739_v30 }
 0x3da   : > { %2743 = vmatpush3.bf16.msra.mxu0 %v2852_v4 }
 0x3db   : > { %1339 = vperm.xlu0 %2837, %v1249_v0   ;;  %1369 = vperm.xlu1 %2836, %v1255_v50  }
 0x3dc   : > { %v1188_v13 = vpop.permute.xlu1 %1187  ;;  %v1203_v26 = vpop.permute.xlu0 %1202  ;;  %2744 = vmatprep.subr.bf16.mxu0 %v4431_v33 }
 0x3dd   : > { %v1256_v11 = vmul.f32 %v1188_v13, %v3720_v61  ;;  %v1259_v51 = vmul.f32 %v1203_v26, %v3722_v32  ;;  %v2861_v13 = vld [vmem:[%s3266_s8 + $0x8] sm:$0xff] }
 0x3df   : > { %1374 = vperm.xlu0 %2837, %v1256_v11   ;;  %v2862_v11 = vld [vmem:[%s3266_s8] sm:$0xff] }
 0x3e0   : > { %v1173_v14 = vpop.permute.xlu1 %1172  ;;  %v1158_v1 = vpop.permute.xlu0 %1157 }
 0x3e1   : > { %v1253_v56 = vmul.f32 %v1173_v14, %v3729_v25  ;;  %v1250_v53 = vmul.f32 %v1158_v1, %v3739_v30  ;;  %v2863_v1 = vld [vmem:[%s3266_s8 + $0x28] sm:$0xff] }
 0x3e3   : > { %1359 = vperm.xlu1 %2836, %v1253_v56   ;;  %1324 = vperm.xlu0 %2837, %v1246_v28  }
 0x3e4   : > { %v1207_v17 = vpop.permute.xlu1 %1206  ;;  %v1222_v58 = vpop.permute.xlu0 %1221 }
 0x3e5   : > { %v1260_v59 = vmul.f32 %v1207_v17, %v3720_v61  ;;  %v1263_v16 = vmul.f32 %v1222_v58, %v3722_v32 }
 0x3e7   : > { %1394 = vperm.xlu1 %2836, %v1260_v59   ;;  %1389 = vperm.xlu0 %2837, %v1259_v51   ;;  %v2864_v59 = vld [vmem:[%s3266_s8 + $0x20] sm:$0xff] }
 0x3e8   : > { %v1192_v31 = vpop.permute.xlu1 %1191  ;;  %v1177_v39 = vpop.permute.xlu0 %1176 }
 0x3e9   : > { %v1257_v24 = vmul.f32 %v1192_v31, %v3729_v25  ;;  %v1254_v20 = vmul.f32 %v1177_v39, %v3739_v30 }
 0x3eb   : > { %1379 = vperm.xlu1 %2836, %v1257_v24   ;;  %1344 = vperm.xlu0 %2837, %v1250_v53   ;;  %v2865_v53 = vld [vmem:[%s3266_s8 + $0x40] sm:$0xff] }
 0x3ec   : > { %v1226_v40 = vpop.permute.xlu1 %1225  ;;  %v1196_v49 = vpop.permute.xlu0 %1195 }
 0x3ed   : > { %v1264_v37 = vmul.f32 %v1226_v40, %v3720_v61  ;;  %v1258_v42 = vmul.f32 %v1196_v49, %v3739_v30  ;;  %v2866_v40 = vld [vmem:[%s3266_s8 + $0x10] sm:$0xff] }
 0x3ef   : > { %1414 = vperm.xlu1 %2836, %v1264_v37   ;;  %1409 = vperm.xlu0 %2837, %v1263_v16   ;;  %v2867_v37 = vld [vmem:[%s3266_s8 + $0x48] sm:$0xff] }
 0x3f0   : > { %v1211_v19 = vpop.permute.xlu1 %1210  ;;  %v1215_v43 = vpop.permute.xlu0 %1214 }
 0x3f1   : > { %v1261_v54 = vmul.f32 %v1211_v19, %v3729_v25  ;;  %v1262_v52 = vmul.f32 %v1215_v43, %v3739_v30 }
 0x3f3   : > { %1399 = vperm.xlu0 %2837, %v1261_v54   ;;  %1364 = vperm.xlu1 %2836, %v1254_v20   ;;  %v2868_v54 = vld [vmem:[%s3266_s8 + $0x30] sm:$0xff] }
 0x3f4   : > { %v1230_v41 = vpop.permute.xlu1 %1229 }
 0x3f5   : > { %v1265_v21 = vmul.f32 %v1230_v41, %v3729_v25 }
 0x3f7   : > { %1419 = vperm.xlu0 %2837, %v1265_v21   ;;  %1384 = vperm.xlu1 %2836, %v1258_v42  }
 0x3f8   : > { %v1234_v46 = vpop.permute.xlu1 %1233 }
 0x3f9   : > { %v1266_v60 = vmul.f32 %v1234_v46, %v3739_v30 }
 0x3fb   : > { %1424 = vperm.xlu0 %2837, %v1266_v60   ;;  %1404 = vperm.xlu1 %2836, %v1262_v52  }
 0x3ff   : > { %2011 = vperm.xlu0 %2837, %v3722_v32  }
 0x403   : > { %2021 = vperm.xlu0 %2837, %v3729_v25   ;;  %v2853_v25 = vld [vmem:[#allocation5 + $0x78] sm:$0xff]  }
 0x404   : > { %2745 = vmatpush3.bf16.msra.mxu0 %v2853_v25 }
 0x405   : > { %2746 = vmatprep.subr.bf16.mxu0 %v4431_v33 }
 0x43a   : > { %v1275_v32 = vpop.permute.xlu1 %1274  ;;  %v1270_v44 = vpop.permute.xlu0 %1269 }
 0x43b   : > { %v1428_v26 = vmul.f32 %v2861_v13, %v1275_v32  ;;  %v1427_v14 = vmul.f32 %v2862_v11, %v1270_v44 }
 0x43d   : > { %v1480_v58 = vadd.f32 %v3712_v55, %v1428_v26  ;;  %v1479_v51 = vadd.f32 %v3714_v9, %v1427_v14  ;;  %v2873_v26 = vld [vmem:[%s3266_s8 + $0x60] sm:$0xff]  ;;  %v2874_v14 = vld [vmem:[%s3266_s8 + $0x88] sm:$0xff] }
 0x43e   : > { %v1290_v45 = vpop.permute.xlu1 %1289 }
 0x43f   : > { %v1431_v31 = vmul.f32 %v2864_v59, %v1290_v45  ;;  %v3787_v42 = vmax.f32 %v1480_v58, 0.0  ;;  %v3789_v21 = vmax.f32 %v1479_v51, 0.0  ;;  %v2871_v45 = vld [vmem:[%s3266_s8 + $0x50] sm:$0xff] }
 0x441   : > { %v1483_v43 = vadd.f32 %v3714_v9, %v1431_v31 }
 0x442   : > { %v1310_v18 = vpop.permute.xlu1 %1309  ;;  %v1295_v23 = vpop.permute.xlu0 %1294 }
 0x443   : > { %v1432_v28 = vmul.f32 %v2863_v1, %v1295_v23  ;;  %v1435_v24 = vmul.f32 %v2865_v53, %v1310_v18  ;;  %v2872_v23 = vld [vmem:[%s3266_s8 + $0x68] sm:$0xff]  ;;  %v2875_v1 = vld [vmem:[%s3266_s8 + $0x80] sm:$0xff] }
 0x445   : > { %v1484_v39 = vadd.f32 %v3712_v55, %v1432_v28  ;;  %v1487_v46 = vadd.f32 %v3714_v9, %v1435_v24 }
 0x446   : > { %v1280_v62 = vpop.permute.xlu1 %1279  ;;  %v1315_v5 = vpop.permute.xlu0 %1314 }
 0x447   : > { %v1429_v16 = vmul.f32 %v2866_v40, %v1280_v62  ;;  %v1436_v49 = vmul.f32 %v2867_v37, %v1315_v5  ;;  %v3793_v52 = vmax.f32 %v1484_v39, 0.0  ;;  %v1657_v5 = vsel %vm303_vm0, %v3787_v42, -inf }
 0x449   : > { %v1481_v60 = vadd.f32 %v3718_v57, %v1429_v16  ;;  %v1488_v2 = vadd.f32 %v3712_v55, %v1436_v49  ;;  %v1670_v13 = vsel %vm303_vm0, %v3793_v52, -inf  ;;  %v2876_v16 = vld [vmem:[%s3266_s8 + $0x70] sm:$0xff]  ;;  %v2877_v49 = vld [vmem:[%s3266_s8 + $0x58] sm:$0xff] }
 0x44a   : > { %v1330_v6 = vpop.permute.xlu1 %1329  ;;  %v1300_v47 = vpop.permute.xlu0 %1299 }
 0x44b   : > { %v1433_v41 = vmul.f32 %v2868_v54, %v1300_v47  ;;  %v1656_v47 = vsel %vm303_vm0, %v3789_v21, -inf  ;;  %v1439_v11 = vmul.f32 %v2873_v26, %v1330_v6  ;;  %v3819_v28 = vmax.f32 %v1481_v60, 0.0 }
 0x44c   : > { %v3821_v58 = vmax.f32 %v1488_v2, 0.0  ;;  %v1658_v53 = vmax.f32 %v1656_v47, %v1657_v5 }
 0x44d   : > { %v1485_v44 = vadd.f32 %v3718_v57, %v1433_v41  ;;  %v1659_v2 = vsel %vm303_vm0, %v3819_v28, -inf }
 0x44e   : > { %v1320_v7 = vpop.permute.xlu1 %1319  ;;  %v1335_v36 = vpop.permute.xlu0 %1334 }
 0x44f   : > { %v1437_v18 = vmul.f32 %v2871_v45, %v1320_v7  ;;  %v1440_v62 = vmul.f32 %v2872_v23, %v1335_v36  ;;  %v3825_v24 = vmax.f32 %v1485_v44, 0.0  ;;  %v2878_v45 = vld [vmem:[%s3266_s8 + $0xa0] sm:$0xff] }
 0x451   : > { %v1489_v6 = vadd.f32 %v3718_v57, %v1437_v18  ;;  %v1492_v39 = vadd.f32 %v3712_v55, %v1440_v62  ;;  %v2879_v62 = vld [vmem:[%s3266_s8 + $0x90] sm:$0xff] }
 0x452   : > { %v1355_v38 = vpop.permute.xlu1 %1354  ;;  %v1350_v48 = vpop.permute.xlu0 %1349 }
 0x453   : > { %v1444_v7 = vmul.f32 %v2874_v14, %v1355_v38  ;;  %v1443_v36 = vmul.f32 %v2875_v1, %v1350_v48  ;;  %v3853_v44 = vmax.f32 %v1492_v39, 0.0 }
 0x455   : > { %v1495_v60 = vadd.f32 %v3714_v9, %v1443_v36 }
 0x456   : > { %v1285_v8 = vpop.permute.xlu0 %1284  ;;  %v1305_v50 = vpop.permute.xlu1 %1304 }
 0x457   : > { %v1434_v63 = vmul.f32 %v2869_v15, %v1305_v50  ;;  %v1430_v4 = vmul.f32 %v2870_v3, %v1285_v8  ;;  %v3810_v50 = vmax.f32 %v1483_v43, 0.0  ;;  %v3812_v8 = vmax.f32 %v1487_v46, 0.0 }
 0x458   : > { %v1491_v43 = vadd.f32 %v3714_v9, %v1439_v11  ;;  %v1496_v46 = vadd.f32 %v3712_v55, %v1444_v7  ;;  %v1683_v15 = vsel %vm303_vm0, %v3821_v58, -inf  ;;  %v1672_v3 = vsel %vm303_vm0, %v3825_v24, -inf }
 0x459   : > { %v1486_v51 = vadd.f32 %v3716_v10, %v1434_v63  ;;  %v1482_v59 = vadd.f32 %v3716_v10, %v1430_v4  ;;  %v1669_v48 = vsel %vm303_vm0, %v3810_v50, -inf  ;;  %v1682_v40 = vsel %vm303_vm0, %v3812_v8, -inf }
 0x45a   : > { %v3768_v0 = vpop.permute.xlu0 %1339  ;;  %v3773_v56 = vpop.permute.xlu1 %1369  ;;  %v1671_v41 = vmax.f32 %v1669_v48, %v1670_v13  ;;  %v3851_v4 = vmax.f32 %v1489_v6, 0.0  ;;  %v2880_v13 = vld [vmem:[%s3266_s8 + $0x78] sm:$0xff]  ;;  %v1660_v11 = vmax.f32 %v1658_v53, %v1659_v2  ;;  %v3862_v14 = vmax.f32 %v1491_v43, 0.0 }
 0x45b   : > { %v1441_v37 = vmul.f32 %v2876_v16, %v3768_v0  ;;  %v3843_v63 = vmax.f32 %v1486_v51, 0.0  ;;  %v3845_v0 = vmax.f32 %v1482_v59, 0.0  ;;  %v1447_v18 = vmul.f32 %v2878_v45, %v3773_v56 }
 0x45c   : > { %v3864_v7 = vmax.f32 %v1496_v46, 0.0  ;;  %v3866_v1 = vmax.f32 %v1495_v60, 0.0  ;;  %v1684_v53 = vmax.f32 %v1682_v40, %v1683_v15  ;;  %v1673_v39 = vmax.f32 %v1671_v41, %v1672_v3  ;;  %v2882_v46 = vld [vmem:[%s3266_s8 + $0xb0] sm:$0xff] }
 0x45d   : > { %v1493_v23 = vadd.f32 %v3718_v57, %v1441_v37  ;;  %v1674_v56 = vsel %vm303_vm0, %v3843_v63, -inf  ;;  %v1661_v51 = vsel %vm303_vm0, %v3845_v0, -inf  ;;  %v1696_v48 = vsel %vm303_vm0, %v3853_v44, -inf }
 0x45e   : > { %v3775_v17 = vpop.permute.xlu0 %1374  ;;  %v1499_v37 = vadd.f32 %v3714_v9, %v1447_v18  ;;  %v1675_v40 = vmax.f32 %v1673_v39, %v1674_v56  ;;  %v3887_v41 = vmax.f32 %v1660_v11, %v1661_v51  ;;  %v1709_v2 = vsel %vm303_vm0, %v3864_v7, -inf }
 0x45f   : > { %v1708_v15 = vsel %vm303_vm0, %v3866_v1, -inf }
 0x460   : > { %v1710_v56 = vmax.f32 %v1708_v15, %v1709_v2  ;;  %v1676_v51 = vrot.slane %v1675_v40, 4  ;;  %v2886_v2 = vld [vmem:[%s3266_s8 + $0xe8] sm:$0xff] }
 0x462   : > { %v3784_v19 = vpop.permute.xlu1 %1359  ;;  %v1325_v20 = vpop.permute.xlu0 %1324  ;;  %v1677_v33 = vmax.f32 %v1675_v40, %v1676_v51 }
 0x463   : > { %v1438_v54 = vmul.f32 %v2877_v49, %v1325_v20  ;;  %v1445_v5 = vmul.f32 %v2879_v62, %v3784_v19  ;;  %v2881_v19 = vld [vmem:[%s3266_s8 + $0xa8] sm:$0xff]  ;;  %v3880_v49 = vmax.f32 %v1493_v23, 0.0 }
 0x464   : > { %v1448_v59 = vmul.f32 %v2881_v19, %v3775_v17  ;;  %v1695_v17 = vsel %vm303_vm0, %v3862_v14, -inf  ;;  %v2883_v62 = vld [vmem:[%s3266_s8 + $0xc8] sm:$0xff]  ;;  %v1663_v19 = vrot.slane %v3887_v41, 4  ;;  %v1678_v27 = vrot.slane %v1677_v33, 2 }
 0x465   : > { %v1490_v47 = vadd.f32 %v3716_v10, %v1438_v54  ;;  %v1497_v54 = vadd.f32 %v3718_v57, %v1445_v5  ;;  %v1697_v23 = vmax.f32 %v1695_v17, %v1696_v48  ;;  %v2885_v48 = vld [vmem:[%s3266_s8 + $0x98] sm:$0xff] }
 0x466   : > { %v3799_v32 = vpop.permute.xlu1 %1394  ;;  %v3801_v25 = vpop.permute.xlu0 %1389  ;;  %v1500_v3 = vadd.f32 %v3712_v55, %v1448_v59 }
 0x467   : > { %v3883_v43 = vmax.f32 %v1490_v47, 0.0  ;;  %v1452_v5 = vmul.f32 %v2883_v62, %v3799_v32  ;;  %v2887_v62 = vld [vmem:[%s3266_s8 + $0xd0] sm:$0xff] }
 0x469   : > { %v1687_v11 = vsel %vm303_vm0, %v3883_v43, -inf }
 0x46a   : > { %v1380_v31 = vpop.permute.xlu1 %1379  ;;  %v1345_v38 = vpop.permute.xlu0 %1344 }
 0x46b   : > { %v1442_v26 = vmul.f32 %v2880_v13, %v1345_v38  ;;  %v1685_v38 = vsel %vm303_vm0, %v3851_v4, -inf  ;;  %v1449_v60 = vmul.f32 %v2882_v46, %v1380_v31  ;;  %v3899_v13 = vmax.f32 %v1499_v37, 0.0 }
 0x46c   : > { %v1686_v18 = vmax.f32 %v1684_v53, %v1685_v38  ;;  %v1698_v31 = vsel %vm303_vm0, %v3880_v49, -inf  ;;  %v2884_v53 = vld [vmem:[%s3266_s8 + $0xc0] sm:$0xff]  ;;  %v1504_v46 = vadd.f32 %v3712_v55, %v1452_v5 }
 0x46d   : > { %v1494_v6 = vadd.f32 %v3716_v10, %v1442_v26  ;;  %v3903_v26 = vmax.f32 %v1497_v54, 0.0  ;;  %v1501_v59 = vadd.f32 %v3718_v57, %v1449_v60  ;;  %v1451_v39 = vmul.f32 %v2884_v53, %v3801_v25 }
 0x46e   : > { %v3847_v20 = vpop.permute.xlu1 %1414  ;;  %v1410_v36 = vpop.permute.xlu0 %1409  ;;  %v1699_v54 = vmax.f32 %v1697_v23, %v1698_v31  ;;  %v1688_v17 = vmax.f32 %v1686_v18, %v1687_v11  ;;  %v1721_v15 = vsel %vm303_vm0, %v3899_v13, -inf  ;;  %v2888_v23 = vld [vmem:[%s3266_s8 + $0xe0] sm:$0xff]  ;;  %v3934_v40 = vmax.f32 %v1504_v46, 0.0 }
 0x46f   : > { %v3895_v45 = vmax.f32 %v1494_v6, 0.0  ;;  %v3909_v6 = vmax.f32 %v1500_v3, 0.0  ;;  %v1456_v60 = vmul.f32 %v2886_v2, %v3847_v20  ;;  %v1711_v25 = vsel %vm303_vm0, %v3903_v26, -inf  ;;  %v2889_v2 = vld [vmem:[%s3266_s8 + $0xb8] sm:$0xff] }
 0x470   : > { %v1455_v5 = vmul.f32 %v2888_v23, %v1410_v36  ;;  %v1503_v11 = vadd.f32 %v3714_v9, %v1451_v39  ;;  %v1689_v34 = vrot.slane %v1688_v17, 4  ;;  %v2890_v39 = vld [vmem:[%s3266_s8 + $0xf0] sm:$0xff]  ;;  %v2891_v23 = vld [vmem:[%s3266_s8 + $0xd8] sm:$0xff] }
 0x471   : > { %v1700_v38 = vsel %vm303_vm0, %v3895_v45, -inf  ;;  %v1722_v20 = vsel %vm303_vm0, %v3909_v6, -inf }
 0x472   : > { %v1365_v16 = vpop.permute.xlu1 %1364  ;;  %v1400_v47 = vpop.permute.xlu0 %1399  ;;  %v1701_v18 = vmax.f32 %v1699_v54, %v1700_v38 }
 0x473   : > { %v1446_v37 = vmul.f32 %v2885_v48, %v1365_v16  ;;  %v1453_v53 = vmul.f32 %v2887_v62, %v1400_v47  ;;  %v3925_v16 = vmax.f32 %v1501_v59, 0.0  ;;  %v1508_v47 = vadd.f32 %v3712_v55, %v1456_v60 }
 0x474   : > { %v3945_v62 = vmax.f32 %v1503_v11, 0.0  ;;  %v1735_v11 = vsel %vm303_vm0, %v3934_v40, -inf }
 0x475   : > { %v1498_v3 = vadd.f32 %v3716_v10, %v1446_v37  ;;  %v1712_v37 = vmax.f32 %v1710_v56, %v1711_v25  ;;  %v1505_v59 = vadd.f32 %v3718_v57, %v1453_v53  ;;  %v1702_v56 = vrot.slane %v1701_v18, 4 }
 0x476   : > { %v1385_v32 = vpop.permute.xlu1 %1384  ;;  %v1420_v31 = vpop.permute.xlu0 %1419  ;;  %v1507_v25 = vadd.f32 %v3714_v9, %v1455_v5  ;;  %v1664_v53 = vmax.f32 %v3887_v41, %v1663_v19 }
 0x477   : > { %v3931_v48 = vmax.f32 %v1498_v3, 0.0  ;;  %v1450_v35 = vmul.f32 %v2889_v2, %v1385_v32  ;;  %v1457_v54 = vmul.f32 %v2890_v39, %v1420_v31  ;;  %v1724_v32 = vsel %vm303_vm0, %v3925_v16, -inf }
 0x478   : > { %v1723_v3 = vmax.f32 %v1721_v15, %v1722_v20  ;;  %v3951_v39 = vmax.f32 %v1505_v59, 0.0  ;;  %v1679_v59 = vmax.f32 %v1677_v33, %v1678_v27 }
 0x479   : > { %v1713_v36 = vsel %vm303_vm0, %v3931_v48, -inf  ;;  %v1502_v38 = vadd.f32 %v3716_v10, %v1450_v35  ;;  %v1690_v35 = vmax.f32 %v1688_v17, %v1689_v34  ;;  %v1509_v15 = vadd.f32 %v3718_v57, %v1457_v54 }
 0x47a   : > { %v1405_v51 = vpop.permute.xlu1 %1404  ;;  %v1714_v46 = vmax.f32 %v1712_v37, %v1713_v36  ;;  %v1725_v31 = vmax.f32 %v1723_v3, %v1724_v32  ;;  %v1425_v20 = vpop.permute.xlu0 %1424  ;;  %v1703_v37 = vmax.f32 %v1701_v18, %v1702_v56  ;;  %v3960_v36 = vmax.f32 %v1507_v25, 0.0  ;;  %v2892_v32 = vld [vmem:[%s3266_s8 + $0xf8] sm:$0xff] }
 0x47b   : > { %v3947_v60 = vmax.f32 %v1502_v38, 0.0  ;;  %v1454_v2 = vmul.f32 %v2891_v23, %v1405_v51  ;;  %v3958_v51 = vmax.f32 %v1508_v47, 0.0  ;;  %v1734_v34 = vsel %vm303_vm0, %v3945_v62, -inf }
 0x47c   : > { %v1715_v29 = vrot.slane %v1714_v46, 4  ;;  %4476 = vst [vmem:[#allocation22_spill] sm:$0xff] %v3960_v36  ;;  %v1665_v38 = vrot.slane %v1664_v53, 2  ;;  %v1458_v54 = vmul.f32 %v2892_v32, %v1425_v20  ;;  %v1691_v3 = vrot.slane %v1690_v35, 2 }
 0x47d   : > { %v1726_v5 = vsel %vm303_vm0, %v3947_v60, -inf  ;;  %v1506_v17 = vadd.f32 %v3716_v10, %v1454_v2  ;;  %v1737_v23 = vsel %vm303_vm0, %v3951_v39, -inf  ;;  %v3968_v47 = vmax.f32 %v1509_v15, 0.0 }
 0x47e   : > { %v1716_v41 = vmax.f32 %v1714_v46, %v1715_v29  ;;  %v1727_v19 = vmax.f32 %v1725_v31, %v1726_v5  ;;  %v1736_v56 = vmax.f32 %v1734_v34, %v1735_v11  ;;  %v1704_v25 = vrot.slane %v1703_v37, 2 }
 0x47f   : > { %4477 = vst [vmem:[#allocation23_spill] sm:$0xff] %v3968_v47  ;;  %v1748_v57 = vsel %vm303_vm0, %v3958_v51, -inf  ;;  %v1747_v29 = vsel %vm303_vm0, %v3960_v36, -inf  ;;  %v3974_v27 = vmax.f32 %v1506_v17, 0.0  ;;  %v1510_v2 = vadd.f32 %v3716_v10, %v1458_v54 }
 0x480   : > { %v1728_v18 = vrot.slane %v1727_v19, 4  ;;  %v1717_v46 = vrot.slane %v1716_v41, 2  ;;  %v1666_v31 = vmax.f32 %v1664_v53, %v1665_v38  ;;  %v1738_v5 = vmax.f32 %v1736_v56, %v1737_v23 }
 0x481   : > { %v1692_v20 = vmax.f32 %v1690_v35, %v1691_v3  ;;  %v1750_v15 = vsel %vm303_vm0, %v3968_v47, -inf  ;;  %v1739_v11 = vsel %vm303_vm0, %v3974_v27, -inf  ;;  %v1705_v34 = vmax.f32 %v1703_v37, %v1704_v25 }
 0x482   : > { %v1729_v33 = vmax.f32 %v1727_v19, %v1728_v18  ;;  %v1749_v9 = vmax.f32 %v1747_v29, %v1748_v57  ;;  %v1740_v55 = vmax.f32 %v1738_v5, %v1739_v11  ;;  %v1680_v12 = vrot.slane %v1679_v59, 1 }
 0x483   : > { %v1718_v22 = vmax.f32 %v1716_v41, %v1717_v46  ;;  %v3981_v19 = vmax.f32 %v1510_v2, 0.0  ;;  %v1667_v17 = vrot.slane %v1666_v31, 1  ;;  %v1693_v38 = vrot.slane %v1692_v20, 1  ;;  %v2854_v46 = vld [vmem:[#allocation5 + $0x80] ss:$0 sps:$4 sm:$0x11]  }
 0x484   : > { %v1730_v32 = vrot.slane %v1729_v33, 2  ;;  %v1751_v54 = vmax.f32 %v1749_v9, %v1750_v15  ;;  %v1741_v53 = vrot.slane %v1740_v55, 4  ;;  %v1706_v3 = vrot.slane %v1705_v34, 1 }
 0x485   : > { %4478 = vst [vmem:[#allocation24_spill] sm:$0xff] %v3981_v19  ;;  %v1752_v35 = vsel %vm303_vm0, %v3981_v19, -inf  ;;  %v1681_v10 = vmax.f32 %v1679_v59, %v1680_v12  ;;  %v1719_v47 = vrot.slane %v1718_v22, 1  ;;  %v1668_v37 = vmax.f32 %v1666_v31, %v1667_v17 }
 0x486   : > { %v1731_v18 = vmax.f32 %v1729_v33, %v1730_v32  ;;  %v1742_v23 = vmax.f32 %v1740_v55, %v1741_v53  ;;  %v1753_v56 = vmax.f32 %v1751_v54, %v1752_v35  ;;  %v1694_v41 = vmax.f32 %v1692_v20, %v1693_v38 }
 0x487   : > { %v1707_v2 = vmax.f32 %v1705_v34, %v1706_v3  ;;  %v1720_v5 = vmax.f32 %v1718_v22, %v1719_v47  ;;  %v1841_v32 = vsel %vm1839_vm13, %v2854_v46, 0  ;;  %v1784_v55 = vsel %vm721_vm5, %v1681_v10, %v1668_v37 }
 0x488   : > { %v1743_v57 = vrot.slane %v1742_v23, 2  ;;  %v1754_v25 = vrot.slane %v1753_v56, 4  ;;  %v1732_v29 = vrot.slane %v1731_v18, 1  ;;  %2747 = vmatpush3.bf16.msra.mxu0 %v1841_v32  ;;  %v1785_v12 = vsel %vm723_vm6, %v1694_v41, %v1784_v55 }
 0x489   : > { %v1786_v17 = vsel %vm725_vm7, %v1707_v2, %v1785_v12  ;;  %v1544_v10 = vsel %vm303_vm0, %v3787_v42, 0.0  ;;  %v1557_v53 = vsel %vm303_vm0, %v3793_v52, 0.0  ;;  %v1570_v38 = vsel %vm303_vm0, %v3821_v58, 0.0 }
 0x48a   : > { %v1755_v33 = vmax.f32 %v1753_v56, %v1754_v25  ;;  %v1744_v9 = vmax.f32 %v1742_v23, %v1743_v57  ;;  %v1733_v15 = vmax.f32 %v1731_v18, %v1732_v29  ;;  %v1787_v20 = vsel %vm727_vm8, %v1720_v5, %v1786_v17 }
 0x48b   : > { %v1556_v3 = vsel %vm303_vm0, %v3810_v50, 0.0  ;;  %v1569_v23 = vsel %vm303_vm0, %v3812_v8, 0.0  ;;  %v1572_v37 = vsel %vm303_vm0, %v3851_v4, 0.0  ;;  %v1583_v57 = vsel %vm303_vm0, %v3853_v44, 0.0 }
 0x48c   : > { %v1745_v11 = vrot.slane %v1744_v9, 1  ;;  %v1756_v19 = vrot.slane %v1755_v33, 2  ;;  %v1788_v34 = vsel %vm729_vm9, %v1733_v15, %v1787_v20  ;;  %v1558_v56 = vadd.f32 %v1557_v53, %v1556_v3 }
 0x48d   : > { %v1571_v25 = vadd.f32 %v1570_v38, %v1569_v23  ;;  %v1596_v29 = vsel %vm303_vm0, %v3864_v7, 0.0  ;;  %v1595_v41 = vsel %vm303_vm0, %v3866_v1, 0.0  ;;  %v1561_v46 = vsel %vm303_vm0, %v3843_v63, 0.0 }
 0x48e   : > { %v1746_v59 = vmax.f32 %v1744_v9, %v1745_v11  ;;  %v1757_v31 = vmax.f32 %v1755_v33, %v1756_v19  ;;  %v1543_v19 = vsel %vm303_vm0, %v3789_v21, 0.0  ;;  %v1582_v33 = vsel %vm303_vm0, %v3862_v14, 0.0 }
 0x48f   : > { %v1545_v35 = vadd.f32 %v1544_v10, %v1543_v19  ;;  %v1548_v5 = vsel %vm303_vm0, %v3845_v0, 0.0  ;;  %v1573_v32 = vadd.f32 %v1572_v37, %v1571_v25  ;;  %v1584_v15 = vadd.f32 %v1583_v57, %v1582_v33 }
 0x490   : > { %v1758_v54 = vrot.slane %v1757_v31, 1  ;;  %v1789_v22 = vsel %vm731_vm10, %v1746_v59, %v1788_v34  ;;  %v1585_v11 = vsel %vm303_vm0, %v3880_v49, 0.0  ;;  %v1609_v55 = vsel %vm303_vm0, %v3909_v6, 0.0 }
 0x491   : > { %v1597_v12 = vadd.f32 %v1596_v29, %v1595_v41  ;;  %v1574_v17 = vsel %vm303_vm0, %v3883_v43, 0.0  ;;  %v1622_v34 = vsel %vm303_vm0, %v3934_v40, 0.0  ;;  %v1611_v10 = vsel %vm303_vm0, %v3925_v16, 0.0 }
 0x492   : > { %v1759_v47 = vmax.f32 %v1757_v31, %v1758_v54  ;;  %v1598_v31 = vsel %vm303_vm0, %v3903_v26, 0.0  ;;  %v1608_v54 = vsel %vm303_vm0, %v3899_v13, 0.0  ;;  %v1587_v19 = vsel %vm303_vm0, %v3895_v45, 0.0 }
 0x493   : > { %v1599_v53 = vadd.f32 %v1598_v31, %v1597_v12  ;;  %v1575_v38 = vadd.f32 %v1574_v17, %v1573_v32  ;;  %v1624_v3 = vsel %vm303_vm0, %v3951_v39, 0.0  ;;  %v1634_v23 = vsel %vm303_vm0, %v3960_v36, 0.0 }
 0x494   : > { %v1790_v18 = vsel %vm733_vm11, %v1759_v47, %v1789_v22  ;;  %v1621_v22 = vsel %vm303_vm0, %v3945_v62, 0.0  ;;  %v1586_v47 = vadd.f32 %v1585_v11, %v1584_v15  ;;  %v1626_v25 = vsel %vm303_vm0, %v3974_v27, 0.0 }
 0x495   : > { %1791 = vrot.lane.b32.xlu1 %v1790_v18, %s3061_s18  ;;  %v1610_v18 = vadd.f32 %v1609_v55, %v1608_v54  ;;  %v1576_v15 = vrot.slane %v1575_v38, 4  ;;  %v4480_v55 = vld [vmem:[#allocation24_spill] sm:$0xff] }
 0x496   : > { %v1588_v57 = vadd.f32 %v1587_v19, %v1586_v47  ;;  %v1639_v12 = vsel %vm303_vm0, %v4480_v55, 0.0 }
 0x497   : > { %v1612_v37 = vadd.f32 %v1611_v10, %v1610_v18  ;;  %v1577_v10 = vadd.f32 %v1576_v15, %v1575_v38 }
 0x498   : > { %v1589_v31 = vrot.slane %v1588_v57, 4 }
 0x499   : > { %2016 = vperm.xlu1 %2836, %v3720_v61   ;;  %v1546_v61 = vsel %vm303_vm0, %v3819_v28, 0.0 }
 0x49a   : > { %v1547_v2 = vadd.f32 %v1546_v61, %v1545_v35  ;;  %v1600_v35 = vsel %vm303_vm0, %v3931_v48, 0.0  ;;  %v1623_v61 = vadd.f32 %v1622_v34, %v1621_v22 }
 0x49b   : > { %v1601_v29 = vadd.f32 %v1600_v35, %v1599_v53  ;;  %v1590_v53 = vadd.f32 %v1589_v31, %v1588_v57 }
 0x49c   : > { %v1549_v20 = vadd.f32 %v1548_v5, %v1547_v2  ;;  %v1625_v41 = vadd.f32 %v1624_v3, %v1623_v61 }
 0x49d   : > { %2026 = vperm.xlu1 %2836, %v3739_v30   ;;  %v1559_v30 = vsel %vm303_vm0, %v3825_v24, 0.0  ;;  %v1602_v54 = vrot.slane %v1601_v29, 4 }
 0x49e   : > { %v1560_v9 = vadd.f32 %v1559_v30, %v1558_v56  ;;  %v1635_v30 = vsel %vm303_vm0, %v3958_v51, 0.0  ;;  %v1613_v56 = vsel %vm303_vm0, %v3947_v60, 0.0  ;;  %v1627_v11 = vadd.f32 %v1626_v25, %v1625_v41 }
 0x49f   : > { %v1636_v5 = vadd.f32 %v1635_v30, %v1634_v23  ;;  %v1614_v32 = vadd.f32 %v1613_v56, %v1612_v37  ;;  %v1603_v35 = vadd.f32 %v1602_v54, %v1601_v29  ;;  %v1578_v56 = vrot.slane %v1577_v10, 2 }
 0x4a0   : > { %v1562_v59 = vadd.f32 %v1561_v46, %v1560_v9  ;;  %v4479_v46 = vld [vmem:[#allocation23_spill] sm:$0xff]  ;;  %v1550_v9 = vrot.slane %v1549_v20, 4  ;;  %v1628_v19 = vrot.slane %v1627_v11, 4  ;;  %v1591_v25 = vrot.slane %v1590_v53, 2 }
 0x4a1   : > { %v1637_v2 = vsel %vm303_vm0, %v4479_v46, 0.0  ;;  %v1615_v47 = vrot.slane %v1614_v32, 4  ;;  %v1604_v41 = vrot.slane %v1603_v35, 2 }
 0x4a2   : > { %v1563_v33 = vrot.slane %v1562_v59, 4  ;;  %v1638_v17 = vadd.f32 %v1637_v2, %v1636_v5  ;;  %v1551_v22 = vadd.f32 %v1550_v9, %v1549_v20  ;;  %v1629_v37 = vadd.f32 %v1628_v19, %v1627_v11 }
 0x4a3   : > { %v1616_v30 = vadd.f32 %v1615_v47, %v1614_v32  ;;  %v1605_v9 = vadd.f32 %v1604_v41, %v1603_v35 }
 0x4a4   : > { %v1564_v34 = vadd.f32 %v1563_v33, %v1562_v59  ;;  %v1640_v18 = vadd.f32 %v1639_v12, %v1638_v17  ;;  %v1552_v61 = vrot.slane %v1551_v22, 2  ;;  %v1579_v59 = vadd.f32 %v1578_v56, %v1577_v10 }
 0x4a5   : > { %v1617_v2 = vrot.slane %v1616_v30, 2  ;;  %v1630_v20 = vrot.slane %v1629_v37, 2  ;;  %v1592_v33 = vadd.f32 %v1591_v25, %v1590_v53  ;;  %v1606_v17 = vrot.slane %v1605_v9, 1 }
 0x4a6   : > { %v1565_v3 = vrot.slane %v1564_v34, 2  ;;  %v1641_v23 = vrot.slane %v1640_v18, 4  ;;  %v1553_v36 = vadd.f32 %v1552_v61, %v1551_v22  ;;  %v1580_v12 = vrot.slane %v1579_v59, 1 }
 0x4a7   : > { %v1618_v57 = vadd.f32 %v1617_v2, %v1616_v30  ;;  %v1631_v31 = vadd.f32 %v1630_v20, %v1629_v37  ;;  %v1593_v32 = vrot.slane %v1592_v33, 1 }
 0x4a8   : > { %v1566_v46 = vadd.f32 %v1565_v3, %v1564_v34  ;;  %v1642_v5 = vadd.f32 %v1641_v23, %v1640_v18  ;;  %v1554_v15 = vrot.slane %v1553_v36, 1  ;;  %v1581_v34 = vadd.f32 %v1580_v12, %v1579_v59 }
 0x4a9   : > { %v1619_v47 = vrot.slane %v1618_v57, 1  ;;  %v1632_v22 = vrot.slane %v1631_v31, 1  ;;  %v1594_v3 = vadd.f32 %v1593_v32, %v1592_v33  ;;  %v1607_v18 = vadd.f32 %v1606_v17, %v1605_v9 }
 0x4aa   : > { %v1567_v38 = vrot.slane %v1566_v46, 1  ;;  %v1643_v29 = vrot.slane %v1642_v5, 2  ;;  %v1555_v11 = vadd.f32 %v1554_v15, %v1553_v36  ;;  %v1650_v23 = vmul.f32 0.03125, %v1581_v34 }
 0x4ab   : > { %v1620_v53 = vadd.f32 %v1619_v47, %v1618_v57  ;;  %v1633_v56 = vadd.f32 %v1632_v22, %v1631_v31  ;;  %v1651_v30 = vmul.f32 0.03125, %v1594_v3  ;;  %v1652_v25 = vmul.f32 0.03125, %v1607_v18  ;;  %v4481_v3 = vld [vmem:[#allocation12_spill] sm:$0xff] }
 0x4ac   : > { %v1568_v54 = vadd.f32 %v1567_v38, %v1566_v46  ;;  %v1644_v19 = vadd.f32 %v1643_v29, %v1642_v5  ;;  %v1648_v61 = vmul.f32 0.03125, %v1555_v11  ;;  %v3062_v11 = vmov 1966171168  }
 0x4ad   : > { %v1653_v41 = vmul.f32 0.03125, %v1620_v53  ;;  %v1654_v46 = vmul.f32 0.03125, %v1633_v56  ;;  %v1890_v47 = vunpack.c.l.s4 %v3062_v11  ;;  %v4483_v11 = vld [vmem:[#allocation18_spill] sm:$0xff] }
 0x4ae   : > { %v1649_v10 = vmul.f32 0.03125, %v1568_v54  ;;  %v1645_v35 = vrot.slane %v1644_v19, 1 }
 0x4b0   : > { %v1768_v37 = vsel %vm721_vm5, %v1649_v10, %v1648_v61  ;;  %v1646_v2 = vadd.f32 %v1645_v35, %v1644_v19  ;;  %v1891_v19 = vunpack.c.0.s8 %v1890_v47 }
 0x4b1   : > { %v1769_v36 = vsel %vm723_vm6, %v1650_v23, %v1768_v37 }
 0x4b2   : > { %v1770_v5 = vsel %vm725_vm7, %v1651_v30, %v1769_v36  ;;  %v1655_v33 = vmul.f32 0.03125, %v1646_v2  ;;  %v4067_v18 = vsub.s32 %v1891_v19, %v4481_v3  ;;  %v4074_v30 = vpop.permute.xlu0 %2011  ;;  %v4482_v2 = vld [vmem:[#allocation17_spill] sm:$0xff] }
 0x4b3   : > { %v1771_v59 = vsel %vm727_vm8, %v1652_v25, %v1770_v5  ;;  %v4114_v3 = vld [vmem:[#allocation7 + $0x40] sm:$0xff] }
 0x4b4   : > { %v1772_v20 = vsel %vm729_vm9, %v1653_v41, %v1771_v59 }
 0x4b5   : > { %v1773_v9 = vsel %vm731_vm10, %v1654_v46, %v1772_v20 }
 0x4b6   : > { %v1774_v15 = vsel %vm733_vm11, %v1655_v33, %v1773_v9 }
 0x507   : > { %v1792_v38 = vpop.permute.xlu1 %1791 }
 0x508   : > { %v1794_v57 = vsel %vm303_vm0, %v1774_v15, %v1792_v38 }
 0x509   : > { %v1795_v29 = vpack.c.bf16 %v1794_v57, %v1794_v57 }
 0x50b   : > { %2749 = vmatmul.mubr.msk.bf16.vlgmr.msra.gmra.mrb[4].mxu0 %vm1835_vm14, %v1795_v29 }
 0x518   : > { %v4076_v25 = vpop.permute.xlu1 %2016 }
 0x5de   : > { %v1877_v12 = vpop.f32.mrb[4].mxu0 }
 0x5df   : > { %v1883_v31 = vmul.f32 0.5, %v1877_v12  ;;  %v2750_v32 = vpop.f32.mrb[5].mxu0 }
 0x5e0   : > { %v1880_v17 = vpop.f32.mrb[6].mxu0  ;;  %v4098_v32 = vpop.permute.xlu1 %2026 }
 0x5e1   : > { %2859 = vtanh.f32 %v1883_v31  ;;  %v2751_v54 = vpop.f32.mrb[7].mxu0  ;;  %v4096_v31 = vpop.permute.xlu0 %2021 }
 0x5eb   : > { %v2860_v34 = vpop.eup %2859 }
 0x5ec   : > { %v1885_v22 = vadd.f32 1.0, %v2860_v34 }
 0x5ee   : > { %v1886_v10 = vmul.f32 0.5, %v1885_v22  ;;  %v4112_v22 = vld [vmem:[#allocation7 + $0x48] sm:$0xff] }
 0x5f0   : > { %v1888_v61 = vcombine.high %v1886_v10, %v1886_v10  ;;  %v1895_v53 = vrot.slane %v1886_v10, %v4067_v18 }
 0x5f2   : > { %v4071_v35 = vrot.slane %v1888_v61, %v4067_v18  ;;  %v1903_v23 = vcombine.high %v1895_v53, %v1895_v53  ;;  %v1911_v56 = vrot.slane %v1895_v53, %v4067_v18 }
 0x5f4   : > { %v1925_v41 = vrot.slane %v1903_v23, %v4067_v18  ;;  %v1933_v37 = vcombine.high %v1911_v56, %v1911_v56  ;;  %v1940_v46 = vrot.slane %v1911_v56, %v4482_v2  ;;  %v4082_v36 = vrot.slane %v4071_v35, %v4067_v18  ;;  %v4486_v56 = vld [vmem:[#allocation21_spill] sm:$0xff] }
 0x5f5   : > { %v1904_v9 = vcombine.high %v4071_v35, %v4071_v35  ;;  %v4485_v35 = vld [vmem:[#allocation20_spill] sm:$0xff] }
 0x5f6   : > { %v1944_v5 = vrot.slane %v1925_v41, %v4482_v2  ;;  %v4086_v59 = vrot.slane %v1933_v37, %v4482_v2  ;;  %v1978_v20 = vmul.f32 %v1940_v46, %v3787_v42  ;;  %v1977_v33 = vmul.f32 %v1940_v46, %v3789_v21  ;;  %v4122_v37 = vld [vmem:[#allocation7 + $0x58] sm:$0xff] }
 0x5f7   : > { %v1935_v38 = vcombine.high %v1925_v41, %v1925_v41  ;;  %v1980_v29 = vmul.f32 %v1940_v46, %v3845_v0  ;;  %v1979_v12 = vmul.f32 %v1940_v46, %v3819_v28  ;;  %v4102_v42 = vrot.slane %v4082_v36, %v4482_v2  ;;  %v4484_v0 = vld [vmem:[#allocation19_spill] sm:$0xff] }
 0x5f8   : > { %v2030_v15 = vmul.f32 %v4076_v25, %v1978_v20  ;;  %v2029_v57 = vmul.f32 %v4074_v30, %v1977_v33  ;;  %v1984_v21 = vmul.f32 %v1944_v5, %v3843_v63  ;;  %v1981_v17 = vmul.f32 %v1944_v5, %v3810_v50  ;;  %v4124_v46 = vld [vmem:[#allocation7 + $0x50] sm:$0xff] }
 0x5f9   : > { %v1986_v54 = vmul.f32 %v4086_v59, %v3821_v58  ;;  %v2032_v28 = vmul.f32 %v4098_v32, %v1980_v29  ;;  %v2031_v34 = vmul.f32 %v4096_v31, %v1979_v12  ;;  %v1982_v58 = vmul.f32 %v1944_v5, %v3793_v52 }
 0x5fa   : > { %v2062_v47 = vadd.f32 %v2030_v15, %v4483_v11  ;;  %v2061_v19 = vadd.f32 %v2029_v57, %v4484_v0  ;;  %v2036_v10 = vmul.f32 %v4098_v32, %v1984_v21  ;;  %v2033_v63 = vmul.f32 %v4074_v30, %v1981_v17 }
 0x5fb   : > { %v2038_v50 = vmul.f32 %v4076_v25, %v1986_v54  ;;  %v2064_v23 = vadd.f32 %v2032_v28, %v4485_v35  ;;  %v2063_v41 = vadd.f32 %v2031_v34, %v4486_v56  ;;  %v2034_v57 = vmul.f32 %v4076_v25, %v1982_v58 }
 0x5fc   : > { %v2094_v61 = vmax.f32 %v2062_v47, 0.0  ;;  %v2093_v53 = vmax.f32 %v2061_v19, 0.0  ;;  %v2068_v20 = vadd.f32 %v2036_v10, %v4485_v35  ;;  %v2065_v33 = vadd.f32 %v2033_v63, %v4484_v0 }
 0x5fd   : > { %v2070_v15 = vadd.f32 %v2038_v50, %v4483_v11  ;;  %v2096_v12 = vmax.f32 %v2064_v23, 0.0  ;;  %v2095_v21 = vmax.f32 %v2063_v41, 0.0  ;;  %v2066_v19 = vadd.f32 %v2034_v57, %v4483_v11 }
 0x5fe   : > { %v2126_v52 = vmul.f32 %v2094_v61, %v4112_v22  ;;  %v2125_v29 = vmul.f32 %v2093_v53, %v4114_v3  ;;  %v2100_v17 = vmax.f32 %v2068_v20, 0.0  ;;  %v2097_v54 = vmax.f32 %v2065_v33, 0.0 }
 0x5ff   : > { %v2102_v47 = vmax.f32 %v2070_v15, 0.0  ;;  %v2128_v10 = vmul.f32 %v2096_v12, %v4122_v37  ;;  %v2127_v63 = vmul.f32 %v2095_v21, %v4124_v46  ;;  %v4138_v50 = vrot.slane %v1935_v38, %v4482_v2 }
 0x600   : > { %v2160_v28 = vsel %vm303_vm0, %v2126_v52, 0.0  ;;  %v2157_v34 = vsel %vm303_vm0, %v2125_v29, 0.0  ;;  %v2132_v58 = vmul.f32 %v2100_v17, %v4122_v37  ;;  %v2129_v61 = vmul.f32 %v2097_v54, %v4114_v3 }
 0x601   : > { %2161 = vadd.xlane.f32.xlu1 %v2160_v28  ;;  %2158 = vadd.xlane.f32.xlu0 %v2157_v34  ;;  %v4143_v53 = vrot.slane %v1904_v9, %v4067_v18  ;;  %v2134_v23 = vmul.f32 %v2102_v47, %v4112_v22  ;;  %v1988_v41 = vmul.f32 %v4086_v59, %v3883_v43  ;;  %v2166_v33 = vsel %vm303_vm0, %v2128_v10, 0.0 }
 0x602   : > { %v1983_v20 = vmul.f32 %v1944_v5, %v3825_v24  ;;  %v2163_v38 = vsel %vm303_vm0, %v2127_v63, 0.0  ;;  %v2178_v15 = vsel %vm303_vm0, %v2132_v58, 0.0  ;;  %v2098_v57 = vmax.f32 %v2066_v19, 0.0 }
 0x603   : > { %v2040_v52 = vmul.f32 %v4098_v32, %v1988_v41  ;;  %v1994_v18 = vmul.f32 %v4102_v42, %v3864_v7  ;;  %v1985_v9 = vmul.f32 %v4086_v59, %v3812_v8  ;;  %v2169_v24 = vsel %vm303_vm0, %v2129_v61, 0.0 }
 0x604   : > { %v2035_v29 = vmul.f32 %v4096_v31, %v1983_v20  ;;  %v1996_v43 = vmul.f32 %v4102_v42, %v3931_v48  ;;  %v1987_v5 = vmul.f32 %v4086_v59, %v3851_v4  ;;  %v1990_v12 = vmul.f32 %v4138_v50, %v3853_v44 }
 0x605   : > { %2167 = vadd.xlane.f32.xlu1 %v2166_v33  ;;  %2164 = vadd.xlane.f32.xlu0 %v2163_v38  ;;  %v2072_v21 = vadd.f32 %v2040_v52, %v4485_v35  ;;  %v2046_v17 = vmul.f32 %v4076_v25, %v1994_v18  ;;  %v2037_v8 = vmul.f32 %v4074_v30, %v1985_v9  ;;  %v2184_v33 = vsel %vm303_vm0, %v2134_v23, 0.0 }
 0x606   : > { %v2067_v7 = vadd.f32 %v2035_v29, %v4486_v56  ;;  %v2130_v54 = vmul.f32 %v2098_v57, %v4112_v22  ;;  %v2048_v47 = vmul.f32 %v4098_v32, %v1996_v43  ;;  %v2039_v48 = vmul.f32 %v4096_v31, %v1987_v5 }
 0x607   : > { %v1993_v4 = vmul.f32 %v4102_v42, %v3866_v1  ;;  %v2104_v59 = vmax.f32 %v2072_v21, 0.0  ;;  %v2078_v44 = vadd.f32 %v2046_v17, %v4483_v11  ;;  %v2069_v28 = vadd.f32 %v2037_v8, %v4484_v0 }
 0x608   : > { %v2099_v19 = vmax.f32 %v2067_v7, 0.0  ;;  %v2042_v34 = vmul.f32 %v4076_v25, %v1990_v12  ;;  %v2080_v63 = vadd.f32 %v2048_v47, %v4485_v35  ;;  %v2071_v58 = vadd.f32 %v2039_v48, %v4486_v56 }
 0x609   : > { %2179 = vadd.xlane.f32.xlu1 %v2178_v15  ;;  %2170 = vadd.xlane.f32.xlu0 %v2169_v24  ;;  %v2136_v10 = vmul.f32 %v2104_v59, %v4122_v37  ;;  %v2110_v41 = vmax.f32 %v2078_v44, 0.0  ;;  %v2101_v1 = vmax.f32 %v2069_v28, 0.0  ;;  %v4183_v20 = vrot.slane %v4143_v53, %v4482_v2 }
 0x60a   : > { %v2131_v61 = vmul.f32 %v2099_v19, %v4124_v46  ;;  %v2172_v38 = vsel %vm303_vm0, %v2130_v54, 0.0  ;;  %v2045_v15 = vmul.f32 %v4074_v30, %v1993_v4  ;;  %v1934_v57 = vcombine.high %v4082_v36, %v4082_v36 }
 0x60b   : > { %v2074_v52 = vadd.f32 %v2042_v34, %v4483_v11  ;;  %v2190_v29 = vsel %vm303_vm0, %v2136_v10, 0.0  ;;  %v2112_v18 = vmax.f32 %v2080_v63, 0.0  ;;  %v2103_v9 = vmax.f32 %v2071_v58, 0.0 }
 0x60c   : > { %v1992_v24 = vmul.f32 %v4138_v50, %v3895_v45  ;;  %v2175_v23 = vsel %vm303_vm0, %v2131_v61, 0.0  ;;  %v2142_v43 = vmul.f32 %v2110_v41, %v4112_v22  ;;  %v2133_v5 = vmul.f32 %v2101_v1, %v4114_v3 }
 0x60d   : > { %2185 = vadd.xlane.f32.xlu1 %v2184_v33  ;;  %2173 = vadd.xlane.f32.xlu0 %v2172_v38  ;;  %v1995_v36 = vmul.f32 %v4102_v42, %v3903_v26  ;;  %v2077_v12 = vadd.f32 %v2045_v15, %v4484_v0  ;;  %v1998_v7 = vmul.f32 %v4183_v20, %v3909_v6  ;;  %v2106_v26 = vmax.f32 %v2074_v52, 0.0 }
 0x60e   : > { %v2044_v21 = vmul.f32 %v4098_v32, %v1992_v24  ;;  %v1989_v17 = vmul.f32 %v4138_v50, %v3862_v14  ;;  %v4206_v45 = vrot.slane %v1934_v57, %v4482_v2  ;;  %v2144_v54 = vmul.f32 %v2112_v18, %v4122_v37 }
 0x60f   : > { %v2047_v8 = vmul.f32 %v4096_v31, %v1995_v36  ;;  %v2000_v42 = vmul.f32 %v4183_v20, %v3947_v60  ;;  %v1991_v47 = vmul.f32 %v4138_v50, %v3880_v49  ;;  %v2135_v6 = vmul.f32 %v2103_v9, %v4124_v46 }
 0x610   : > { %v2076_v14 = vadd.f32 %v2044_v21, %v4485_v35  ;;  %v2050_v48 = vmul.f32 %v4076_v25, %v1998_v7  ;;  %v2041_v4 = vmul.f32 %v4074_v30, %v1989_v17  ;;  %v2208_v59 = vsel %vm303_vm0, %v2142_v43, 0.0 }
 0x611   : > { %2191 = vadd.xlane.f32.xlu1 %v2190_v29  ;;  %2176 = vadd.xlane.f32.xlu0 %v2175_v23  ;;  %v2181_v19 = vsel %vm303_vm0, %v2133_v5, 0.0  ;;  %v2109_v44 = vmax.f32 %v2077_v12, 0.0  ;;  %v2079_v28 = vadd.f32 %v2047_v8, %v4486_v56  ;;  %v1936_v60 = vcombine.high %v4143_v53, %v4143_v53 }
 0x612   : > { %v2052_v49 = vmul.f32 %v4098_v32, %v2000_v42  ;;  %v2043_v50 = vmul.f32 %v4096_v31, %v1991_v47  ;;  %v2002_v34 = vmul.f32 %v4206_v45, %v3934_v40  ;;  %v1997_v10 = vmul.f32 %v4183_v20, %v3899_v13 }
 0x613   : > { %v2138_v63 = vmul.f32 %v2106_v26, %v4112_v22  ;;  %v2108_v58 = vmax.f32 %v2076_v14, 0.0  ;;  %v2082_v61 = vadd.f32 %v2050_v48, %v4483_v11  ;;  %v2073_v41 = vadd.f32 %v2041_v4, %v4484_v0 }
 0x614   : > { %v2214_v53 = vsel %vm303_vm0, %v2144_v54, 0.0  ;;  %v2187_v1 = vsel %vm303_vm0, %v2135_v6, 0.0  ;;  %v2141_v33 = vmul.f32 %v2109_v44, %v4114_v3  ;;  %v2111_v38 = vmax.f32 %v2079_v28, 0.0 }
 0x615   : > { %2209 = vadd.xlane.f32.xlu1 %v2208_v59  ;;  %2182 = vadd.xlane.f32.xlu0 %v2181_v19  ;;  %v4236_v15 = vrot.slane %v1936_v60, %v4482_v2  ;;  %v2084_v13 = vadd.f32 %v2052_v49, %v4485_v35  ;;  %v2075_v40 = vadd.f32 %v2043_v50, %v4486_v56  ;;  %v2114_v18 = vmax.f32 %v2082_v61, 0.0 }
 0x616   : > { %v2054_v57 = vmul.f32 %v4076_v25, %v2002_v34  ;;  %v2049_v52 = vmul.f32 %v4074_v30, %v1997_v10  ;;  %v2140_v29 = vmul.f32 %v2108_v58, %v4122_v37  ;;  %v2105_v9 = vmax.f32 %v2073_v41, 0.0 }
 0x617   : > { %v2004_v24 = vmul.f32 %v4206_v45, %v3974_v27  ;;  %v2196_v2 = vsel %vm303_vm0, %v2138_v63, 0.0  ;;  %v2205_v23 = vsel %vm303_vm0, %v2141_v33, 0.0  ;;  %v2143_v43 = vmul.f32 %v2111_v38, %v4124_v46 }
 0x618   : > { %v1999_v5 = vmul.f32 %v4183_v20, %v3925_v16  ;;  %v2116_v36 = vmax.f32 %v2084_v13, 0.0  ;;  %v2107_v12 = vmax.f32 %v2075_v40, 0.0  ;;  %v2086_v21 = vadd.f32 %v2054_v57, %v4483_v11 }
 0x619   : > { %2215 = vadd.xlane.f32.xlu1 %v2214_v53  ;;  %2188 = vadd.xlane.f32.xlu0 %v2187_v1  ;;  %v2081_v7 = vadd.f32 %v2049_v52, %v4484_v0  ;;  %v2202_v17 = vsel %vm303_vm0, %v2140_v29, 0.0  ;;  %v2146_v27 = vmul.f32 %v2114_v18, %v4112_v22  ;;  %v2137_v8 = vmul.f32 %v2105_v9, %v4114_v3  ;;  %v4488_v52 = vld [vmem:[#allocation23_spill] sm:$0xff] }
 0x61a   : > { %v2056_v54 = vmul.f32 %v4098_v32, %v2004_v24  ;;  %v2211_v26 = vsel %vm303_vm0, %v2143_v43, 0.0  ;;  %v2051_v16 = vmul.f32 %v4096_v31, %v1999_v5  ;;  %v2006_v20 = vmul.f32 %v4236_v15, %v3958_v51 }
 0x61b   : > { %v2001_v42 = vmul.f32 %v4206_v45, %v3945_v62  ;;  %v2148_v47 = vmul.f32 %v2116_v36, %v4122_v37  ;;  %v2139_v6 = vmul.f32 %v2107_v12, %v4124_v46  ;;  %v2118_v14 = vmax.f32 %v2086_v21, 0.0 }
 0x61c   : > { %v2113_v48 = vmax.f32 %v2081_v7, 0.0  ;;  %v2220_v4 = vsel %vm303_vm0, %v2146_v27, 0.0  ;;  %v2088_v59 = vadd.f32 %v2056_v54, %v4485_v35  ;;  %v2008_v19 = vmul.f32 %v4236_v15, %v4480_v55  ;;  %v2856_v54 = vld [vmem:[#allocation5 + $0x90] sm:$0xff]  }
 0x61d   : > { %2197 = vadd.xlane.f32.xlu1 %v2196_v2  ;;  %2206 = vadd.xlane.f32.xlu0 %v2205_v23  ;;  %v2003_v51 = vmul.f32 %v4206_v45, %v3951_v39  ;;  %v2193_v62 = vsel %vm303_vm0, %v2137_v8, 0.0  ;;  %v2083_v44 = vadd.f32 %v2051_v16, %v4486_v56  ;;  %v2058_v28 = vmul.f32 %v4076_v25, %v2006_v20  ;;  %v4487_v45 = vld [vmem:[#allocation22_spill] sm:$0xff] }
 0x61e   : > { %v2053_v60 = vmul.f32 %v4074_v30, %v2001_v42  ;;  %v2226_v49 = vsel %vm303_vm0, %v2148_v47, 0.0  ;;  %v2150_v50 = vmul.f32 %v2118_v14, %v4112_v22  ;;  %v2145_v34 = vmul.f32 %v2113_v48, %v4114_v3 }
 0x61f   : > { %v2120_v55 = vmax.f32 %v2088_v59, 0.0  ;;  %v2060_v10 = vmul.f32 %v4098_v32, %v2008_v19  ;;  %v2055_v39 = vmul.f32 %v4096_v31, %v2003_v51  ;;  %v2005_v63 = vmul.f32 %v4236_v15, %v4487_v45 }
 0x620   : > { %v2199_v25 = vsel %vm303_vm0, %v2139_v6, 0.0  ;;  %v2115_v58 = vmax.f32 %v2083_v44, 0.0  ;;  %v2090_v61 = vadd.f32 %v2058_v28, %v4483_v11  ;;  %v2085_v41 = vadd.f32 %v2053_v60, %v4484_v0 }
 0x621   : > { %2203 = vadd.xlane.f32.xlu1 %v2202_v17  ;;  %2212 = vadd.xlane.f32.xlu0 %v2211_v26  ;;  %v2232_v53 = vsel %vm303_vm0, %v2150_v50, 0.0  ;;  %v2217_v1 = vsel %vm303_vm0, %v2145_v34, 0.0  ;;  %v2152_v32 = vmul.f32 %v2120_v55, %v4122_v37  ;;  %v2092_v33 = vadd.f32 %v2060_v10, %v4485_v35 }
 0x622   : > { %v2087_v38 = vadd.f32 %v2055_v39, %v4486_v56  ;;  %v2057_v13 = vmul.f32 %v4074_v30, %v2005_v63  ;;  %v2147_v40 = vmul.f32 %v2115_v58, %v4124_v46  ;;  %v2122_v57 = vmax.f32 %v2090_v61, 0.0 }
 0x623   : > { %v2117_v11 = vmax.f32 %v2085_v41, 0.0  ;;  %v2007_v29 = vmul.f32 %v4236_v15, %v4488_v52  ;;  %v2238_v18 = vsel %vm303_vm0, %v2152_v32, 0.0  ;;  %v2124_v9 = vmax.f32 %v2092_v33, 0.0 }
 0x624   : > { %v2119_v24 = vmax.f32 %v2087_v38, 0.0  ;;  %v2089_v2 = vadd.f32 %v2057_v13, %v4484_v0  ;;  %v2223_v35 = vsel %vm303_vm0, %v2147_v40, 0.0  ;;  %v2154_v23 = vmul.f32 %v2122_v57, %v4112_v22 }
 0x625   : > { %2221 = vadd.xlane.f32.xlu1 %v2220_v4  ;;  %2194 = vadd.xlane.f32.xlu0 %v2193_v62  ;;  %v2149_v30 = vmul.f32 %v2117_v11, %v4114_v3  ;;  %v2059_v43 = vmul.f32 %v4096_v31, %v2007_v29  ;;  %v2156_v15 = vmul.f32 %v2124_v9, %v4122_v37  ;;  %v4489_v26 = vmov 0.0   ;;  %v4490_v11 = vld [vmem:[#allocation14_spill] sm:$0xff] }
 0x626   : > { %v2151_v5 = vmul.f32 %v2119_v24, %v4124_v46  ;;  %v2244_v36 = vsel %vm303_vm0, %v2154_v23, 0.0  ;;  %v2121_v21 = vmax.f32 %v2089_v2, 0.0  ;;  %v4492_v2 = vld [vmem:[#allocation15_spill] sm:$0xff] }
 0x627   : > { %v2229_v12 = vsel %vm303_vm0, %v2149_v30, 0.0  ;;  %v2091_v0 = vadd.f32 %v2059_v43, %v4486_v56  ;;  %v2250_v22 = vsel %vm303_vm0, %v2156_v15, 0.0  ;;  %v2855_v56 = vld [vmem:[#allocation5 + $0x88] sm:$0xff]  }
 0x628   : > { %v2235_v7 = vsel %vm303_vm0, %v2151_v5, 0.0  ;;  %v2153_v31 = vmul.f32 %v2121_v21, %v4114_v3  ;;  %2753 = vmatpush3.bf16.msra.mxu1 %v2855_v56 }
 0x629   : > { %2227 = vadd.xlane.f32.xlu1 %v2226_v49  ;;  %2200 = vadd.xlane.f32.xlu0 %v2199_v25  ;;  %v2123_v17 = vmax.f32 %v2091_v0, 0.0 }
 0x62a   : > { %v2241_v37 = vsel %vm303_vm0, %v2153_v31, 0.0  ;;  %2754 = vmatprep.subr.bf16.mxu1 %v4489_v26 }
 0x62b   : > { %v2155_v27 = vmul.f32 %v2123_v17, %v4124_v46 }
 0x62c   : > { %2755 = vmatpush3.bf16.msra.mxu1 %v2856_v54 }
 0x62d   : > { %2233 = vadd.xlane.f32.xlu1 %v2232_v53  ;;  %2218 = vadd.xlane.f32.xlu0 %v2217_v1  ;;  %v2247_v8 = vsel %vm303_vm0, %v2155_v27, 0.0  ;;  %v4493_v27 = vld [vmem:[#allocation16_spill] sm:$0xff] }
 0x631   : > { %2239 = vadd.xlane.f32.xlu1 %v2238_v18  ;;  %2224 = vadd.xlane.f32.xlu0 %v2223_v35  ;;  %v4491_v18 = vld [vmem:[#allocation13_spill] sm:$0xff] }
 0x635   : > { %2245 = vadd.xlane.f32.xlu1 %v2244_v36  ;;  %2230 = vadd.xlane.f32.xlu0 %v2229_v12 }
 0x639   : > { %2251 = vadd.xlane.f32.xlu1 %v2250_v22  ;;  %2236 = vadd.xlane.f32.xlu0 %v2235_v7 }
 0x63d   : > { %2242 = vadd.xlane.f32.xlu0 %v2241_v37 }
 0x641   : > { %2248 = vadd.xlane.f32.xlu0 %v2247_v8 }
 0x68e   : > { %v2162_v16 = vpop.xlane.xlu1 %2161  ;;  %v2159_v20 = vpop.xlane.xlu0 %2158 }
 0x68f   : > { %v2253_v55 = vpack.c.bf16 %v2162_v16, %v2159_v20 }
 0x691   : > { %v2289_v61 = vunpack.c.l.b16 %v2253_v55  ;;  %v2290_v53 = vunpack.c.h.b16 %v2253_v55 }
 0x692   : > { %v2168_v3 = vpop.xlane.xlu1 %2167  ;;  %v2165_v42 = vpop.xlane.xlu0 %2164 }
 0x693   : > { %v2254_v10 = vpack.c.bf16 %v2168_v3, %v2165_v42  ;;  %v2324_v52 = vrot.slane %v2289_v61, %v4490_v11  ;;  %v2328_v9 = vrot.slane %v2290_v53, %v4491_v18 }
 0x695   : > { %v2291_v1 = vunpack.c.l.b16 %v2254_v10  ;;  %v2292_v24 = vunpack.c.h.b16 %v2254_v10  ;;  %v2329_v37 = vsel %vm572_vm2, %v2328_v9, %v2324_v52 }
 0x696   : > { %v2180_v47 = vpop.xlane.xlu1 %2179  ;;  %v2171_v6 = vpop.xlane.xlu0 %2170 }
 0x697   : > { %v2333_v35 = vrot.slane %v2291_v1, %v4492_v2  ;;  %v2338_v8 = vrot.slane %v2292_v24, %v4493_v27 }
 0x699   : > { %v2334_v26 = vsel %vm579_vm3, %v2333_v35, %v2329_v37 }
 0x69a   : > { %v2186_v14 = vpop.xlane.xlu1 %2185  ;;  %v2174_v48 = vpop.xlane.xlu0 %2173  ;;  %v2339_v55 = vsel %vm586_vm4, %v2338_v8, %v2334_v26 }
 0x69b   : > { %v2255_v39 = vpack.c.bf16 %v2174_v48, %v2171_v6 }
 0x69d   : > { %v2293_v32 = vunpack.c.l.b16 %v2255_v39  ;;  %v2294_v33 = vunpack.c.h.b16 %v2255_v39 }
 0x69e   : > { %v2192_v4 = vpop.xlane.xlu1 %2191  ;;  %v2177_v46 = vpop.xlane.xlu0 %2176 }
 0x69f   : > { %v2256_v45 = vpack.c.bf16 %v2180_v47, %v2177_v46  ;;  %v2343_v43 = vrot.slane %v2293_v32, %v4490_v11  ;;  %v2347_v15 = vrot.slane %v2294_v33, %v4491_v18 }
 0x6a1   : > { %v2295_v38 = vunpack.c.l.b16 %v2256_v45  ;;  %v2296_v5 = vunpack.c.h.b16 %v2256_v45  ;;  %v2348_v16 = vsel %vm572_vm2, %v2347_v15, %v2343_v43 }
 0x6a2   : > { %v2210_v59 = vpop.xlane.xlu1 %2209  ;;  %v2183_v19 = vpop.xlane.xlu0 %2182 }
 0x6a3   : > { %v2257_v63 = vpack.c.bf16 %v2186_v14, %v2183_v19  ;;  %v2352_v12 = vrot.slane %v2295_v38, %v4492_v2  ;;  %v2357_v20 = vrot.slane %v2296_v5, %v4493_v27 }
 0x6a5   : > { %v2297_v13 = vunpack.c.l.b16 %v2257_v63  ;;  %v2298_v40 = vunpack.c.h.b16 %v2257_v63  ;;  %v2353_v42 = vsel %vm579_vm3, %v2352_v12, %v2348_v16 }
 0x6a6   : > { %v2216_v51 = vpop.xlane.xlu1 %2215  ;;  %v2189_v62 = vpop.xlane.xlu0 %2188  ;;  %v2358_v39 = vsel %vm586_vm4, %v2357_v20, %v2353_v42 }
 0x6a7   : > { %v2258_v41 = vpack.c.bf16 %v2192_v4, %v2189_v62  ;;  %v2362_v21 = vrot.slane %v2297_v13, %v4490_v11  ;;  %v2366_v0 = vrot.slane %v2298_v40, %v4491_v18 }
 0x6a9   : > { %v2299_v29 = vunpack.c.l.b16 %v2258_v41  ;;  %v2300_v7 = vunpack.c.h.b16 %v2258_v41  ;;  %v2367_v47 = vsel %vm572_vm2, %v2366_v0, %v2362_v21 }
 0x6aa   : > { %v2198_v44 = vpop.xlane.xlu1 %2197  ;;  %v2207_v28 = vpop.xlane.xlu0 %2206 }
 0x6ab   : > { %v2371_v31 = vrot.slane %v2299_v29, %v4492_v2  ;;  %v2261_v17 = vpack.c.bf16 %v2210_v59, %v2207_v28  ;;  %v2376_v59 = vrot.slane %v2300_v7, %v4493_v27 }
 0x6ad   : > { %v2372_v46 = vsel %vm579_vm3, %v2371_v31, %v2367_v47  ;;  %v2305_v19 = vunpack.c.l.b16 %v2261_v17 }
 0x6ae   : > { %v2204_v60 = vpop.xlane.xlu1 %2203  ;;  %v2213_v49 = vpop.xlane.xlu0 %2212  ;;  %v2377_v61 = vsel %vm586_vm4, %v2376_v59, %v2372_v46 }
 0x6af   : > { %v2262_v28 = vpack.c.bf16 %v2216_v51, %v2213_v49  ;;  %v2400_v49 = vrot.slane %v2305_v19, %v4490_v11 }
 0x6b1   : > { %v2307_v32 = vunpack.c.l.b16 %v2262_v28  ;;  %v2308_v13 = vunpack.c.h.b16 %v2262_v28 }
 0x6b2   : > { %v2222_v50 = vpop.xlane.xlu1 %2221  ;;  %v2195_v34 = vpop.xlane.xlu0 %2194 }
 0x6b3   : > { %v2259_v23 = vpack.c.bf16 %v2198_v44, %v2195_v34  ;;  %v2306_v44 = vunpack.c.h.b16 %v2261_v17  ;;  %v2409_v12 = vrot.slane %v2307_v32, %v4492_v2  ;;  %v2414_v17 = vrot.slane %v2308_v13, %v4493_v27 }
 0x6b5   : > { %v2301_v56 = vunpack.c.l.b16 %v2259_v23  ;;  %v2302_v54 = vunpack.c.h.b16 %v2259_v23  ;;  %v2404_v1 = vrot.slane %v2306_v44, %v4491_v18 }
 0x6b6   : > { %v2228_v25 = vpop.xlane.xlu1 %2227  ;;  %v2201_v58 = vpop.xlane.xlu0 %2200 }
 0x6b7   : > { %v2260_v36 = vpack.c.bf16 %v2204_v60, %v2201_v58  ;;  %v2381_v60 = vrot.slane %v2301_v56, %v4490_v11  ;;  %v2385_v34 = vrot.slane %v2302_v54, %v4491_v18 }
 0x6b9   : > { %v2303_v3 = vunpack.c.l.b16 %v2260_v36  ;;  %v2304_v10 = vunpack.c.h.b16 %v2260_v36  ;;  %v2386_v33 = vsel %vm572_vm2, %v2385_v34, %v2381_v60  ;;  %v2473_v36 = vsel %vm721_vm5, %v2358_v39, %v2339_v55 }
 0x6ba   : > { %v2219_v57 = vpop.xlane.xlu0 %2218  ;;  %v2234_v30 = vpop.xlane.xlu1 %2233  ;;  %v2474_v0 = vsel %vm723_vm6, %v2377_v61, %v2473_v36 }
 0x6bb   : > { %v2263_v6 = vpack.c.bf16 %v2222_v50, %v2219_v57  ;;  %v2390_v50 = vrot.slane %v2303_v3, %v4492_v2  ;;  %v2395_v57 = vrot.slane %v2304_v10, %v4493_v27 }
 0x6bd   : > { %v2309_v45 = vunpack.c.l.b16 %v2263_v6  ;;  %v2310_v63 = vunpack.c.h.b16 %v2263_v6  ;;  %v2391_v40 = vsel %vm579_vm3, %v2390_v50, %v2386_v33 }
 0x6be   : > { %v2225_v22 = vpop.xlane.xlu0 %2224  ;;  %v2240_v14 = vpop.xlane.xlu1 %2239  ;;  %v2396_v37 = vsel %vm586_vm4, %v2395_v57, %v2391_v40 }
 0x6bf   : > { %v2264_v48 = vpack.c.bf16 %v2228_v25, %v2225_v22  ;;  %v2419_v29 = vrot.slane %v2309_v45, %v4490_v11  ;;  %v2423_v9 = vrot.slane %v2310_v63, %v4491_v18  ;;  %v2405_v22 = vsel %vm572_vm2, %v2404_v1, %v2400_v49 }
 0x6c0   : > { %v2410_v47 = vsel %vm579_vm3, %v2409_v12, %v2405_v22 }
 0x6c1   : > { %v2311_v25 = vunpack.c.l.b16 %v2264_v48  ;;  %v2312_v24 = vunpack.c.h.b16 %v2264_v48  ;;  %v2424_v8 = vsel %vm572_vm2, %v2423_v9, %v2419_v29 }
 0x6c2   : > { %v2231_v4 = vpop.xlane.xlu0 %2230  ;;  %v2246_v38 = vpop.xlane.xlu1 %2245 }
 0x6c3   : > { %v2265_v62 = vpack.c.bf16 %v2234_v30, %v2231_v4  ;;  %v2428_v35 = vrot.slane %v2311_v25, %v4492_v2  ;;  %v2433_v56 = vrot.slane %v2312_v24, %v4493_v27  ;;  %v2475_v4 = vsel %vm725_vm7, %v2396_v37, %v2474_v0 }
 0x6c5   : > { %v2313_v41 = vunpack.c.l.b16 %v2265_v62  ;;  %v2314_v53 = vunpack.c.h.b16 %v2265_v62  ;;  %v2429_v16 = vsel %vm579_vm3, %v2428_v35, %v2424_v8  ;;  %v2415_v62 = vsel %vm586_vm4, %v2414_v17, %v2410_v47 }
 0x6c6   : > { %v2237_v58 = vpop.xlane.xlu0 %2236  ;;  %v2252_v54 = vpop.xlane.xlu1 %2251  ;;  %v2434_v19 = vsel %vm586_vm4, %v2433_v56, %v2429_v16 }
 0x6c7   : > { %v2266_v51 = vpack.c.bf16 %v2240_v14, %v2237_v58  ;;  %v2438_v30 = vrot.slane %v2313_v41, %v4490_v11  ;;  %v2442_v43 = vrot.slane %v2314_v53, %v4491_v18 }
 0x6c9   : > { %v2315_v52 = vunpack.c.l.b16 %v2266_v51  ;;  %v2316_v15 = vunpack.c.h.b16 %v2266_v51  ;;  %v2443_v20 = vsel %vm572_vm2, %v2442_v43, %v2438_v30 }
 0x6ca   : > { %v2243_v23 = vpop.xlane.xlu0 %2242 }
 0x6cb   : > { %v2267_v5 = vpack.c.bf16 %v2246_v38, %v2243_v23  ;;  %v2447_v21 = vrot.slane %v2315_v52, %v4492_v2  ;;  %v2452_v3 = vrot.slane %v2316_v15, %v4493_v27 }
 0x6cd   : > { %v2317_v7 = vunpack.c.l.b16 %v2267_v5  ;;  %v2318_v31 = vunpack.c.h.b16 %v2267_v5  ;;  %v2448_v6 = vsel %vm579_vm3, %v2447_v21, %v2443_v20 }
 0x6ce   : > { %v2249_v26 = vpop.xlane.xlu0 %2248  ;;  %v2453_v44 = vsel %vm586_vm4, %v2452_v3, %v2448_v6 }
 0x6cf   : > { %v2268_v42 = vpack.c.bf16 %v2252_v54, %v2249_v26  ;;  %v2457_v14 = vrot.slane %v2317_v7, %v4490_v11  ;;  %v2461_v48 = vrot.slane %v2318_v31, %v4491_v18  ;;  %v2476_v11 = vsel %vm727_vm8, %v2415_v62, %v2475_v4 }
 0x6d0   : > { %v2477_v34 = vsel %vm729_vm9, %v2434_v19, %v2476_v11 }
 0x6d1   : > { %v2319_v46 = vunpack.c.l.b16 %v2268_v42  ;;  %v2320_v59 = vunpack.c.h.b16 %v2268_v42  ;;  %v2462_v18 = vsel %vm572_vm2, %v2461_v48, %v2457_v14  ;;  %v2478_v10 = vsel %vm731_vm10, %v2453_v44, %v2477_v34 }
 0x6d3   : > { %v2466_v28 = vrot.slane %v2319_v46, %v4492_v2  ;;  %v2471_v60 = vrot.slane %v2320_v59, %v4493_v27  ;;  %v2673_v2 = vld [vmem:[#allocation7 + $0x60] ss:$0 sm:$0xff] }
 0x6d5   : > { %v2467_v55 = vsel %vm579_vm3, %v2466_v28, %v2462_v18 }
 0x6d6   : > { %v2472_v50 = vsel %vm586_vm4, %v2471_v60, %v2467_v55 }
 0x6d7   : > { %v2479_v39 = vsel %vm733_vm11, %v2472_v50, %v2478_v10 }
 0x6d8   : > { %v2480_v45 = vpack.c.b16 %v2479_v39, %v2479_v39 }
 0x6da   : > { %2757 = vmatmul.mubr.msk.bf16.vlgmr.msra.gmra.mrb[4].mxu1 %vm941_vm12, %v2480_v45 }
 0x7ad   : > { %v2530_v27 = vpop.f32.mrb[4].mxu1 }
 0x7ae   : > { %v2531_v63 = vadd.f32 %v2673_v2, %v2530_v27  ;;  %v2758_v25 = vpop.f32.mrb[5].mxu1 }
 0x7af   : > { %v2533_v58 = vpop.f32.mrb[6].mxu1 }
 0x7b0   : > { %2536 = vst [vmem:[%s218_s30] sm:$0xff] %v2531_v63  ;;  %v2759_v61 = vpop.f32.mrb[7].mxu1 }
 0x7b1   : > { %2992 = shalt.err (!%p2989_p2)
}
 0x7b2   : > { %s2993_s21 = scalar_lea.hbm %s4380_s22, 128  ;;  %s2997_s5 = scalar_lea.hbm %s4427_s3, 256 }
 0x7b3   : > { %p2994_p13 = scmp.ne.s32.totalorder %s4380_s22, %s2993_s21  ;;  %p2998_p4 = scmp.lt.u32.totalorder %s4380_s22, %s4427_s3 }
 0x7b4   : > { %p2999_p7 = scmp.lt.u32.totalorder %s2997_s5, %s2993_s21  ;;  %p3001_p11 = scmp.lt.u32.totalorder %s2993_s21, %s4380_s22 }
 0x7b5   : > { %p2995_p6 = pnand %p2994_p13, %p4494_p0 }
 0x7b6   : > { %p3000_p8 = por %p2999_p7, %p2998_p4 }
 0x7b7   : > { %p2996_p10 = pneg %p2995_p6 }
 0x7b8   : > { %p3002_p1 = por %p3001_p11, %p3000_p8 }
 0x7ba   : > { %p3003_p3 = pnand %p3002_p1, %p2996_p10 }
 0x7bc   : > { %3006 = shalt.err (!%p3003_p3)
}
 0x7bd   : > { %2770 = dma.vmem_to_hbm [thread:$0]  (%p4494_p0), %s4382_s24, 128, %s4380_s22, %s2538_s11  }
 0x7be PF: > { %s2563_s18 = sand.u32 1, %s3037_s12   ;;  %p4495_p5 = scmp.ne.s32.totalorder %s4457_s19, 0 }
 0x7bf   : > { %p4496_p9 = scmp.ge.s32.totalorder %s3049_s15, 2  ;;  %s2564_s20 = scalar_lea.sflag [#allocation4], %s2563_s18 }
 0x7c1   : > { %p2784_p12 = pnand %p4496_p9, %p4495_p5 }
 0x7c3   : > { %3032 = dma.done.wait (!%p2784_p12), %s2564_s20, 128  }
 0x7c4   : > { %3034 = vsyncadd (!%p2784_p12), %s2564_s20, 4294967168  ;;  %p17_p2 = scmp.ge.s32.totalorder %s3197_s6, 4   ;;  %s4497_s12 = smov %s3041_s13 }
 0x7c5   : > { %s4498_s13 = smov %s3045_s14  ;;  %s4499_s14 = smov %s3206_s9 }
 0x7c6   : > { %s4500_s15 = smov %s3197_s6  ;;  %19 = sbr.rel (!%p17_p2) target bundleno = 6 (0x6), region = 85 }
 0x7cd   :  { %2569 = vsyncpa [#allocation3], 1 }
 0x7ce   :  { %2571 = vsyncpa [#allocation3 + $0x1], 1 }
 0x7cf   :  { %2572 = vsyncpa [#allocation6], 1 }
 0x7d0   :  { %2573 = vsyncpa [#allocation4], 1 }
 0x7d1   :  { %2575 = vsyncpa [#allocation4 + $0x1], 1 }

</bundles_post_ra>
